<compile_context>
chip_gen: v7x
topology: tpu7x:2x2x1
jax: 0.10.0
libtpu: 0.0.40
codegen_flags: <defaults>
</compile_context>

<pallas_src>
import functools

import jax
import jax.numpy as jnp
import numpy as np
from jax.experimental import pallas as pl
from jax.experimental.pallas import tpu as pltpu

EPS = 1e-5


def _bottleneck_kernel(x_ref, g1_ref, b1_ref, gs1_ref, ge1_ref, w1sc_ref,
                       g2_ref, b2_ref, gs2_ref, ge2_ref, w2b_ref, srow_ref,
                       g3_ref, b3_ref, gs3_ref, ge3_ref, w3_ref,
                       o_ref, *, stride):
    N, H, WCin = x_ref.shape
    _, Ho, WoCout = o_ref.shape
    Cin = g1_ref.shape[1]
    P = g2_ref.shape[1]
    W = WCin // Cin
    WP = W * P
    NHo = N * Ho
    s = stride

    def bn_relu(v, g, b, gsum, gexp):
        # Training-mode BatchNorm (biased variance) + ReLU on a lane-dense
        # (rows, groups*C) view.  Row reductions run on the MXU via a ones-row matmul;
        # gsum (groups*C, C) group-reduces columns per channel, gexp (C, groups*C)
        # expands per-channel scalars back to the dense lane layout.
        rows, wc = v.shape
        groups = wc // g.shape[1]
        inv_n = 1.0 / (rows * groups)
        ones_r = jnp.ones((1, rows), jnp.float32)
        s1 = jnp.dot(jnp.dot(ones_r, v, preferred_element_type=jnp.float32),
                     gsum, preferred_element_type=jnp.float32)              # (1, C)
        mu_c = s1 * inv_n
        mu = jnp.dot(mu_c, gexp, preferred_element_type=jnp.float32)        # (1, wc)
        d = v - mu
        # Two-pass (centered) variance: avoids E[x^2]-E[x]^2 cancellation.
        var_c = jnp.dot(jnp.dot(ones_r, d * d, preferred_element_type=jnp.float32),
                        gsum, preferred_element_type=jnp.float32) * inv_n   # (1, C)
        scale_c = g * jax.lax.rsqrt(var_c + EPS)
        scale = jnp.dot(scale_c, gexp, preferred_element_type=jnp.float32)  # (1, wc)
        shift = jnp.dot(b, gexp, preferred_element_type=jnp.float32)        # (1, wc)
        return jnp.maximum(d * scale + shift, 0.0)

    # ---- bn1 + relu on the lane-dense (N*H, W*Cin) view ----
    x2d = x_ref[...].reshape(N * H, WCin)
    r1 = bn_relu(x2d, g1_ref[...], b1_ref[...], gs1_ref[...], ge1_ref[...])

    # ---- conv1 (1x1) and shortcut (1x1, stride s) fused into ONE matmul ----
    cat = jnp.dot(r1, w1sc_ref[...], preferred_element_type=jnp.float32)
    h1 = cat[:, :WP]                  # (N*H, W*P)
    sc = cat[:, WP:]                  # (N*H, Wo*Cout)  (W already subsampled by weight)
    if s == 1:
        shortcut = sc                 # rows already match (N*Ho, Wo*Cout)
    else:
        # Row subsample h = s*ho is exactly the middle (kh=1) row-selection matrix.
        # TODO(synk): stride>1 path is correct by construction but not exercised below.
        shortcut = jnp.dot(srow_ref[NHo:2 * NHo, :], sc,
                           preferred_element_type=jnp.float32)

    # ---- bn2 + relu ----
    r2 = bn_relu(h1, g2_ref[...], b2_ref[...], gs2_ref[...], ge2_ref[...])

    # ---- conv2 (3x3, stride s, pad 1):  h2 = sum_kh  S_kh @ (r2 @ B_kh)  ----
    # B_kh (W*P, Wo*P) encodes the kw taps + W padding/stride; S_kh (N*Ho, N*H) encodes
    # the H shift + H padding/stride.  All MXU, no padded scratch, no masked stores.
    taps = []
    for kh in range(3):
        cb = jnp.dot(r2, w2b_ref[kh * WP:(kh + 1) * WP, :],
                     preferred_element_type=jnp.float32)            # (N*H, Wo*P)
        taps.append(jnp.dot(srow_ref[kh * NHo:(kh + 1) * NHo, :], cb,
                            preferred_element_type=jnp.float32))    # (N*Ho, Wo*P)
    h2 = taps[0] + taps[1] + taps[2]

    # ---- bn3 + relu, conv3 (1x1 block-diagonal) + residual add ----
    r3 = bn_relu(h2, g3_ref[...], b3_ref[...], gs3_ref[...], ge3_ref[...])
    out = jnp.dot(r3, w3_ref[...], preferred_element_type=jnp.float32) + shortcut

    # Already in the lane-dense output layout; leading-dim split only (no relayout).
    o_ref[...] = out.reshape(N, Ho, WoCout)


def _build_operands(params, N, H, W, Ho, Wo, stride):
    """Host-side construction of the dense/banded/selection matrices."""
    w1 = np.asarray(params["w1"], np.float32)        # (Cin, P)
    wsc = np.asarray(params["wsc"], np.float32)      # (Cin, Cout)
    w3 = np.asarray(params["w3"], np.float32)        # (P, Cout)
    w2 = np.asarray(params["w2_oihw"], np.float32)   # (P, P, 3, 3)  OIHW
    cin, p = w1.shape
    cout = wsc.shape[1]

    # conv1 block-diagonal + shortcut (stride baked into column placement), fused.
    w1_bd = np.kron(np.eye(W, dtype=np.float32), w1)                 # (W*Cin, W*P)
    wsc_bd = np.zeros((W * cin, Wo * cout), np.float32)
    for wo in range(Wo):
        w_in = stride * wo
        wsc_bd[w_in * cin:(w_in + 1) * cin, wo * cout:(wo + 1) * cout] = wsc
    w1sc = np.concatenate([w1_bd, wsc_bd], axis=1)

    # conv2 banded weights (W taps/padding/stride) stacked over kh.
    w2b = np.zeros((3 * W * p, Wo * p), np.float32)
    for kh in range(3):
        for wo in range(Wo):
            for kw in range(3):
                w_in = stride * wo + kw - 1
                if 0 <= w_in < W:
                    w2b[kh * W * p + w_in * p: kh * W * p + (w_in + 1) * p,
                        wo * p:(wo + 1) * p] = w2[:, :, kh, kw].T    # (ci, co)

    # conv2 row-selection matrices (H taps/padding/stride, per image), stacked over kh.
    srow = np.zeros((3 * N * Ho, N * H), np.float32)
    for kh in range(3):
        for n in range(N):
            for ho in range(Ho):
                h_in = stride * ho + kh - 1
                if 0 <= h_in < H:
                    srow[kh * N * Ho + n * Ho + ho, n * H + h_in] = 1.0

    # conv3 block-diagonal.
    w3bd = np.kron(np.eye(Wo, dtype=np.float32), w3)                 # (Wo*P, Wo*Cout)

    # BN group-reduce / dense-expand matrices.
    def gmats(width, c):
        gsum = np.tile(np.eye(c, dtype=np.float32), (width, 1))      # (width*c, c)
        return jnp.asarray(gsum), jnp.asarray(gsum.T)

    gs1, ge1 = gmats(W, cin)
    gs2, ge2 = gmats(W, p)
    gs3, ge3 = gmats(Wo, p)
    return dict(w1sc=jnp.asarray(w1sc), w2b=jnp.asarray(w2b), srow=jnp.asarray(srow),
                w3bd=jnp.asarray(w3bd), gs1=gs1, ge1=ge1, gs2=gs2, ge2=ge2,
                gs3=gs3, ge3=ge3)


def preact_bottleneck_pallas(x_nhwc, params, stride=1):
    """x_nhwc: (N, H, W, Cin) float32; params: see make_params."""
    N, H, W, Cin = x_nhwc.shape
    Cout = params["w3"].shape[1]
    Ho = (H + 2 - 3) // stride + 1
    Wo = (W + 2 - 3) // stride + 1

    ops = _build_operands(params, N, H, W, Ho, Wo, stride)
    # Row-major metadata reshape so the kernel's (N*H, W*Cin) view needs no relayout.
    x_dense = x_nhwc.reshape(N, H, W * Cin)

    args = (x_dense,
            params["g1"], params["b1"], ops["gs1"], ops["ge1"], ops["w1sc"],
            params["g2"], params["b2"], ops["gs2"], ops["ge2"], ops["w2b"], ops["srow"],
            params["g3"], params["b3"], ops["gs3"], ops["ge3"], ops["w3bd"])

    def full(shape):
        nd = len(shape)
        return pl.BlockSpec(shape, lambda i, _nd=nd: (0,) * _nd)

    fn = pl.pallas_call(
        functools.partial(_bottleneck_kernel, stride=stride),
        out_shape=jax.ShapeDtypeStruct((N, Ho, Wo * Cout), jnp.float32),
        grid=(1,),
        in_specs=[full(a.shape) for a in args],
        out_specs=full((N, Ho, Wo * Cout)),
        compiler_params=pltpu.CompilerParams(
            dimension_semantics=("arbitrary",)),
    )
    out_flat = fn(*args)
    return out_flat.reshape(N, Ho, Wo, Cout)


def preact_bottleneck_ref(x_nhwc, params, stride=1):
    """Pure-JAX reference (NHWC, HWIO kernels, training-mode BN)."""
    def bn(v, g, b):
        mu = v.mean(axis=(0, 1, 2), keepdims=True)
        var = ((v - mu) ** 2).mean(axis=(0, 1, 2), keepdims=True)
        return (v - mu) / jnp.sqrt(var + EPS) * g.reshape(1, 1, 1, -1) + b.reshape(1, 1, 1, -1)

    def conv(v, w_hwio, s, pad):
        return jax.lax.conv_general_dilated(
            v, w_hwio, (s, s), pad, dimension_numbers=("NHWC", "HWIO", "NHWC"))

    r1 = jax.nn.relu(bn(x_nhwc, params["g1"], params["b1"]))
    sc = conv(r1, params["wsc_hwio"], stride, "VALID")
    h = conv(r1, params["w1_hwio"], 1, "VALID")
    h = conv(jax.nn.relu(bn(h, params["g2"], params["b2"])), params["w2_hwio"],
             stride, [(1, 1), (1, 1)])
    h = conv(jax.nn.relu(bn(h, params["g3"], params["b3"])), params["w3_hwio"],
             1, "VALID")
    return h + sc


def make_params(key, in_planes, planes):
    """Deterministic synthetic parameters, created in PyTorch (OIHW) layout then
    converted to the kernel's matmul layouts."""
    expansion = 4
    cout = expansion * planes
    keys = jax.random.split(key, 10)

    # PyTorch-layout conv weights (O, I, kH, kW)
    w1_t = jax.random.normal(keys[0], (planes, in_planes, 1, 1), jnp.float32) * 0.2
    w2_t = jax.random.normal(keys[1], (planes, planes, 3, 3), jnp.float32) * 0.2
    w3_t = jax.random.normal(keys[2], (cout, planes, 1, 1), jnp.float32) * 0.2
    wsc_t = jax.random.normal(keys[3], (cout, in_planes, 1, 1), jnp.float32) * 0.2

    # BatchNorm affine params (random, deterministic)
    g1 = 1.0 + 0.1 * jax.random.normal(keys[4], (in_planes,), jnp.float32)
    b1 = 0.1 * jax.random.normal(keys[5], (in_planes,), jnp.float32)
    g2 = 1.0 + 0.1 * jax.random.normal(keys[6], (planes,), jnp.float32)
    b2 = 0.1 * jax.random.normal(keys[7], (planes,), jnp.float32)
    g3 = 1.0 + 0.1 * jax.random.normal(keys[8], (planes,), jnp.float32)
    b3 = 0.1 * jax.random.normal(keys[9], (planes,), jnp.float32)

    params = {
        # base matmul layouts (per-pixel); dense matrices are built in _build_operands
        "w1": w1_t.reshape(planes, in_planes).T,        # (Cin, P)
        "wsc": wsc_t.reshape(cout, in_planes).T,        # (Cin, 4P)
        "w3": w3_t.reshape(cout, planes).T,             # (P, 4P)
        "w2_oihw": w2_t,                                # (P, P, 3, 3)
        "g1": g1.reshape(1, -1), "b1": b1.reshape(1, -1),
        "g2": g2.reshape(1, -1), "b2": b2.reshape(1, -1),
        "g3": g3.reshape(1, -1), "b3": b3.reshape(1, -1),
        # HWIO layouts for the pure-JAX reference
        "w1_hwio": jnp.transpose(w1_t, (2, 3, 1, 0)),
        "w2_hwio": jnp.transpose(w2_t, (2, 3, 1, 0)),
        "w3_hwio": jnp.transpose(w3_t, (2, 3, 1, 0)),
        "wsc_hwio": jnp.transpose(wsc_t, (2, 3, 1, 0)),
    }
    return params


if __name__ == "__main__":
    # Small shapes consistent with the module: x is NCHW (2, 4, 16, 16),
    # in_planes=4, planes=4 (so expansion*planes=16 != in_planes -> shortcut conv), stride=1.
    N, Cin, H, W = 2, 4, 16, 16
    planes, stride = 4, 1

    key = jax.random.PRNGKey(0)
    kx, kp = jax.random.split(key)
    x_nchw = jax.random.normal(kx, (N, Cin, H, W), jnp.float32)
    params = make_params(kp, Cin, planes)

    # boundary glue: NCHW -> NHWC
    x_nhwc = jnp.transpose(x_nchw, (0, 2, 3, 1))

    out = preact_bottleneck_pallas(x_nhwc, params, stride=stride)
    out = jax.block_until_ready(out)

    ref = preact_bottleneck_ref(x_nhwc, params, stride=stride)
    ref = jax.block_until_ready(ref)

    assert out.shape == (N, H, W, 4 * planes), out.shape
    max_err = float(jnp.max(jnp.abs(out - ref)))
    assert max_err < 1e-3, f"mismatch vs reference, max abs err = {max_err}"

    print("KERNEL_OK")
</pallas_src>

<mosaic_0001>
module attributes {stable_mosaic.version = 11 : i64} {
  func.func @_bottleneck_kernel(%arg0: i32, %arg1: memref<2x16x64xf32, #tpu.memory_space<vmem>>, %arg2: memref<1x4xf32, #tpu.memory_space<vmem>>, %arg3: memref<1x4xf32, #tpu.memory_space<vmem>>, %arg4: memref<64x4xf32, #tpu.memory_space<vmem>>, %arg5: memref<4x64xf32, #tpu.memory_space<vmem>>, %arg6: memref<64x320xf32, #tpu.memory_space<vmem>>, %arg7: memref<1x4xf32, #tpu.memory_space<vmem>>, %arg8: memref<1x4xf32, #tpu.memory_space<vmem>>, %arg9: memref<64x4xf32, #tpu.memory_space<vmem>>, %arg10: memref<4x64xf32, #tpu.memory_space<vmem>>, %arg11: memref<192x64xf32, #tpu.memory_space<vmem>>, %arg12: memref<96x32xf32, #tpu.memory_space<vmem>>, %arg13: memref<1x4xf32, #tpu.memory_space<vmem>>, %arg14: memref<1x4xf32, #tpu.memory_space<vmem>>, %arg15: memref<64x4xf32, #tpu.memory_space<vmem>>, %arg16: memref<4x64xf32, #tpu.memory_space<vmem>>, %arg17: memref<64x256xf32, #tpu.memory_space<vmem>>, %arg18: memref<2x16x256xf32, #tpu.memory_space<vmem>>) attributes {dimension_semantics = [#tpu.dimension_semantics<arbitrary>], iteration_bounds = array<i64: 1>, scalar_prefetch = 0 : i64, scratch_operands = 0 : i64, tpu.core_type = #tpu.core_type<tc>, window_params = [{pipeline_mode = #tpu.pipeline_mode<synchronous>, transform_indices = @transform_0, window_bounds = array<i64: 2, 16, 64>}, {pipeline_mode = #tpu.pipeline_mode<synchronous>, transform_indices = @transform_1, window_bounds = array<i64: 1, 4>}, {pipeline_mode = #tpu.pipeline_mode<synchronous>, transform_indices = @transform_2, window_bounds = array<i64: 1, 4>}, {pipeline_mode = #tpu.pipeline_mode<synchronous>, transform_indices = @transform_3, window_bounds = array<i64: 64, 4>}, {pipeline_mode = #tpu.pipeline_mode<synchronous>, transform_indices = @transform_4, window_bounds = array<i64: 4, 64>}, {pipeline_mode = #tpu.pipeline_mode<synchronous>, transform_indices = @transform_5, window_bounds = array<i64: 64, 320>}, {pipeline_mode = #tpu.pipeline_mode<synchronous>, transform_indices = @transform_6, window_bounds = array<i64: 1, 4>}, {pipeline_mode = #tpu.pipeline_mode<synchronous>, transform_indices = @transform_7, window_bounds = array<i64: 1, 4>}, {pipeline_mode = #tpu.pipeline_mode<synchronous>, transform_indices = @transform_8, window_bounds = array<i64: 64, 4>}, {pipeline_mode = #tpu.pipeline_mode<synchronous>, transform_indices = @transform_9, window_bounds = array<i64: 4, 64>}, {pipeline_mode = #tpu.pipeline_mode<synchronous>, transform_indices = @transform_10, window_bounds = array<i64: 192, 64>}, {pipeline_mode = #tpu.pipeline_mode<synchronous>, transform_indices = @transform_11, window_bounds = array<i64: 96, 32>}, {pipeline_mode = #tpu.pipeline_mode<synchronous>, transform_indices = @transform_12, window_bounds = array<i64: 1, 4>}, {pipeline_mode = #tpu.pipeline_mode<synchronous>, transform_indices = @transform_13, window_bounds = array<i64: 1, 4>}, {pipeline_mode = #tpu.pipeline_mode<synchronous>, transform_indices = @transform_14, window_bounds = array<i64: 64, 4>}, {pipeline_mode = #tpu.pipeline_mode<synchronous>, transform_indices = @transform_15, window_bounds = array<i64: 4, 64>}, {pipeline_mode = #tpu.pipeline_mode<synchronous>, transform_indices = @transform_16, window_bounds = array<i64: 64, 256>}, {pipeline_mode = #tpu.pipeline_mode<synchronous>, transform_indices = @transform_17, window_bounds = array<i64: 2, 16, 256>}]} {
    %c0 = arith.constant 0 : index
    %c0_0 = arith.constant 0 : index
    %c0_1 = arith.constant 0 : index
    %0 = vector.load %arg1[%c0, %c0_0, %c0_1] : memref<2x16x64xf32, #tpu.memory_space<vmem>>, vector<2x16x64xf32>
    %1 = vector.shape_cast %0 : vector<2x16x64xf32> to vector<32x64xf32>
    %c0_2 = arith.constant 0 : index
    %c0_3 = arith.constant 0 : index
    %2 = vector.load %arg2[%c0_2, %c0_3] : memref<1x4xf32, #tpu.memory_space<vmem>>, vector<1x4xf32>
    %c0_4 = arith.constant 0 : index
    %c0_5 = arith.constant 0 : index
    %3 = vector.load %arg3[%c0_4, %c0_5] : memref<1x4xf32, #tpu.memory_space<vmem>>, vector<1x4xf32>
    %c0_6 = arith.constant 0 : index
    %c0_7 = arith.constant 0 : index
    %4 = vector.load %arg4[%c0_6, %c0_7] : memref<64x4xf32, #tpu.memory_space<vmem>>, vector<64x4xf32>
    %c0_8 = arith.constant 0 : index
    %c0_9 = arith.constant 0 : index
    %5 = vector.load %arg5[%c0_8, %c0_9] : memref<4x64xf32, #tpu.memory_space<vmem>>, vector<4x64xf32>
    %cst = arith.constant 1.000000e+00 : f32
    %6 = vector.broadcast %cst : f32 to vector<1x32xf32>
    %cst_10 = arith.constant dense<0.000000e+00> : vector<1x64xf32>
    %7 = tpu.matmul %6, %1, %cst_10 {dimension_numbers = #tpu.dot_dimension_numbers<[1], [0], [0], [1], [0, 0, 1, 1], [], []>} : vector<1x32xf32>, vector<32x64xf32>, vector<1x64xf32> -> vector<1x64xf32>
    %cst_11 = arith.constant dense<0.000000e+00> : vector<1x4xf32>
    %8 = tpu.matmul %7, %4, %cst_11 {dimension_numbers = #tpu.dot_dimension_numbers<[1], [0], [0], [1], [0, 0, 1, 1], [], []>} : vector<1x64xf32>, vector<64x4xf32>, vector<1x4xf32> -> vector<1x4xf32>
    %cst_12 = arith.constant 0.001953125 : f32
    %9 = vector.broadcast %cst_12 : f32 to vector<1x4xf32>
    %10 = arith.mulf %8, %9 : vector<1x4xf32>
    %cst_13 = arith.constant dense<0.000000e+00> : vector<1x64xf32>
    %11 = tpu.matmul %10, %5, %cst_13 {dimension_numbers = #tpu.dot_dimension_numbers<[1], [0], [0], [1], [0, 0, 1, 1], [], []>} : vector<1x4xf32>, vector<4x64xf32>, vector<1x64xf32> -> vector<1x64xf32>
    %12 = vector.broadcast %11 : vector<1x64xf32> to vector<32x64xf32>
    %13 = arith.subf %1, %12 : vector<32x64xf32>
    %14 = arith.mulf %13, %13 : vector<32x64xf32>
    %cst_14 = arith.constant dense<0.000000e+00> : vector<1x64xf32>
    %15 = tpu.matmul %6, %14, %cst_14 {dimension_numbers = #tpu.dot_dimension_numbers<[1], [0], [0], [1], [0, 0, 1, 1], [], []>} : vector<1x32xf32>, vector<32x64xf32>, vector<1x64xf32> -> vector<1x64xf32>
    %cst_15 = arith.constant dense<0.000000e+00> : vector<1x4xf32>
    %16 = tpu.matmul %15, %4, %cst_15 {dimension_numbers = #tpu.dot_dimension_numbers<[1], [0], [0], [1], [0, 0, 1, 1], [], []>} : vector<1x64xf32>, vector<64x4xf32>, vector<1x4xf32> -> vector<1x4xf32>
    %cst_16 = arith.constant 0.001953125 : f32
    %17 = vector.broadcast %cst_16 : f32 to vector<1x4xf32>
    %18 = arith.mulf %16, %17 : vector<1x4xf32>
    %cst_17 = arith.constant 9.99999974E-6 : f32
    %19 = vector.broadcast %cst_17 : f32 to vector<1x4xf32>
    %20 = arith.addf %18, %19 : vector<1x4xf32>
    %21 = math.rsqrt %20 : vector<1x4xf32>
    %22 = arith.mulf %2, %21 : vector<1x4xf32>
    %cst_18 = arith.constant dense<0.000000e+00> : vector<1x64xf32>
    %23 = tpu.matmul %22, %5, %cst_18 {dimension_numbers = #tpu.dot_dimension_numbers<[1], [0], [0], [1], [0, 0, 1, 1], [], []>} : vector<1x4xf32>, vector<4x64xf32>, vector<1x64xf32> -> vector<1x64xf32>
    %cst_19 = arith.constant dense<0.000000e+00> : vector<1x64xf32>
    %24 = tpu.matmul %3, %5, %cst_19 {dimension_numbers = #tpu.dot_dimension_numbers<[1], [0], [0], [1], [0, 0, 1, 1], [], []>} : vector<1x4xf32>, vector<4x64xf32>, vector<1x64xf32> -> vector<1x64xf32>
    %25 = vector.broadcast %23 : vector<1x64xf32> to vector<32x64xf32>
    %26 = arith.mulf %13, %25 : vector<32x64xf32>
    %27 = vector.broadcast %24 : vector<1x64xf32> to vector<32x64xf32>
    %28 = arith.addf %26, %27 : vector<32x64xf32>
    %cst_20 = arith.constant 0.000000e+00 : f32
    %29 = vector.broadcast %cst_20 : f32 to vector<32x64xf32>
    %30 = arith.maximumf %28, %29 : vector<32x64xf32>
    %c0_21 = arith.constant 0 : index
    %c0_22 = arith.constant 0 : index
    %31 = vector.load %arg6[%c0_21, %c0_22] : memref<64x320xf32, #tpu.memory_space<vmem>>, vector<64x320xf32>
    %cst_23 = arith.constant dense<0.000000e+00> : vector<32x320xf32>
    %32 = tpu.matmul %30, %31, %cst_23 {dimension_numbers = #tpu.dot_dimension_numbers<[1], [0], [0], [1], [0, 0, 1, 1], [], []>} : vector<32x64xf32>, vector<64x320xf32>, vector<32x320xf32> -> vector<32x320xf32>
    %33 = vector.extract_strided_slice %32 {offsets = [0, 0], sizes = [32, 64], strides = [1, 1]} : vector<32x320xf32> to vector<32x64xf32>
    %34 = vector.extract_strided_slice %32 {offsets = [0, 64], sizes = [32, 256], strides = [1, 1]} : vector<32x320xf32> to vector<32x256xf32>
    %c0_24 = arith.constant 0 : index
    %c0_25 = arith.constant 0 : index
    %35 = vector.load %arg7[%c0_24, %c0_25] : memref<1x4xf32, #tpu.memory_space<vmem>>, vector<1x4xf32>
    %c0_26 = arith.constant 0 : index
    %c0_27 = arith.constant 0 : index
    %36 = vector.load %arg8[%c0_26, %c0_27] : memref<1x4xf32, #tpu.memory_space<vmem>>, vector<1x4xf32>
    %c0_28 = arith.constant 0 : index
    %c0_29 = arith.constant 0 : index
    %37 = vector.load %arg9[%c0_28, %c0_29] : memref<64x4xf32, #tpu.memory_space<vmem>>, vector<64x4xf32>
    %c0_30 = arith.constant 0 : index
    %c0_31 = arith.constant 0 : index
    %38 = vector.load %arg10[%c0_30, %c0_31] : memref<4x64xf32, #tpu.memory_space<vmem>>, vector<4x64xf32>
    %cst_32 = arith.constant 1.000000e+00 : f32
    %39 = vector.broadcast %cst_32 : f32 to vector<1x32xf32>
    %cst_33 = arith.constant dense<0.000000e+00> : vector<1x64xf32>
    %40 = tpu.matmul %39, %33, %cst_33 {dimension_numbers = #tpu.dot_dimension_numbers<[1], [0], [0], [1], [0, 0, 1, 1], [], []>} : vector<1x32xf32>, vector<32x64xf32>, vector<1x64xf32> -> vector<1x64xf32>
    %cst_34 = arith.constant dense<0.000000e+00> : vector<1x4xf32>
    %41 = tpu.matmul %40, %37, %cst_34 {dimension_numbers = #tpu.dot_dimension_numbers<[1], [0], [0], [1], [0, 0, 1, 1], [], []>} : vector<1x64xf32>, vector<64x4xf32>, vector<1x4xf32> -> vector<1x4xf32>
    %cst_35 = arith.constant 0.001953125 : f32
    %42 = vector.broadcast %cst_35 : f32 to vector<1x4xf32>
    %43 = arith.mulf %41, %42 : vector<1x4xf32>
    %cst_36 = arith.constant dense<0.000000e+00> : vector<1x64xf32>
    %44 = tpu.matmul %43, %38, %cst_36 {dimension_numbers = #tpu.dot_dimension_numbers<[1], [0], [0], [1], [0, 0, 1, 1], [], []>} : vector<1x4xf32>, vector<4x64xf32>, vector<1x64xf32> -> vector<1x64xf32>
    %45 = vector.broadcast %44 : vector<1x64xf32> to vector<32x64xf32>
    %46 = arith.subf %33, %45 : vector<32x64xf32>
    %47 = arith.mulf %46, %46 : vector<32x64xf32>
    %cst_37 = arith.constant dense<0.000000e+00> : vector<1x64xf32>
    %48 = tpu.matmul %39, %47, %cst_37 {dimension_numbers = #tpu.dot_dimension_numbers<[1], [0], [0], [1], [0, 0, 1, 1], [], []>} : vector<1x32xf32>, vector<32x64xf32>, vector<1x64xf32> -> vector<1x64xf32>
    %cst_38 = arith.constant dense<0.000000e+00> : vector<1x4xf32>
    %49 = tpu.matmul %48, %37, %cst_38 {dimension_numbers = #tpu.dot_dimension_numbers<[1], [0], [0], [1], [0, 0, 1, 1], [], []>} : vector<1x64xf32>, vector<64x4xf32>, vector<1x4xf32> -> vector<1x4xf32>
    %cst_39 = arith.constant 0.001953125 : f32
    %50 = vector.broadcast %cst_39 : f32 to vector<1x4xf32>
    %51 = arith.mulf %49, %50 : vector<1x4xf32>
    %cst_40 = arith.constant 9.99999974E-6 : f32
    %52 = vector.broadcast %cst_40 : f32 to vector<1x4xf32>
    %53 = arith.addf %51, %52 : vector<1x4xf32>
    %54 = math.rsqrt %53 : vector<1x4xf32>
    %55 = arith.mulf %35, %54 : vector<1x4xf32>
    %cst_41 = arith.constant dense<0.000000e+00> : vector<1x64xf32>
    %56 = tpu.matmul %55, %38, %cst_41 {dimension_numbers = #tpu.dot_dimension_numbers<[1], [0], [0], [1], [0, 0, 1, 1], [], []>} : vector<1x4xf32>, vector<4x64xf32>, vector<1x64xf32> -> vector<1x64xf32>
    %cst_42 = arith.constant dense<0.000000e+00> : vector<1x64xf32>
    %57 = tpu.matmul %36, %38, %cst_42 {dimension_numbers = #tpu.dot_dimension_numbers<[1], [0], [0], [1], [0, 0, 1, 1], [], []>} : vector<1x4xf32>, vector<4x64xf32>, vector<1x64xf32> -> vector<1x64xf32>
    %58 = vector.broadcast %56 : vector<1x64xf32> to vector<32x64xf32>
    %59 = arith.mulf %46, %58 : vector<32x64xf32>
    %60 = vector.broadcast %57 : vector<1x64xf32> to vector<32x64xf32>
    %61 = arith.addf %59, %60 : vector<32x64xf32>
    %cst_43 = arith.constant 0.000000e+00 : f32
    %62 = vector.broadcast %cst_43 : f32 to vector<32x64xf32>
    %63 = arith.maximumf %61, %62 : vector<32x64xf32>
    %c0_44 = arith.constant 0 : index
    %c0_45 = arith.constant 0 : index
    %64 = vector.load %arg11[%c0_44, %c0_45] : memref<192x64xf32, #tpu.memory_space<vmem>>, vector<64x64xf32>
    %cst_46 = arith.constant dense<0.000000e+00> : vector<32x64xf32>
    %65 = tpu.matmul %63, %64, %cst_46 {dimension_numbers = #tpu.dot_dimension_numbers<[1], [0], [0], [1], [0, 0, 1, 1], [], []>} : vector<32x64xf32>, vector<64x64xf32>, vector<32x64xf32> -> vector<32x64xf32>
    %c0_47 = arith.constant 0 : index
    %c0_48 = arith.constant 0 : index
    %66 = vector.load %arg12[%c0_47, %c0_48] : memref<96x32xf32, #tpu.memory_space<vmem>>, vector<32x32xf32>
    %cst_49 = arith.constant dense<0.000000e+00> : vector<32x64xf32>
    %67 = tpu.matmul %66, %65, %cst_49 {dimension_numbers = #tpu.dot_dimension_numbers<[1], [0], [0], [1], [0, 0, 1, 1], [], []>} : vector<32x32xf32>, vector<32x64xf32>, vector<32x64xf32> -> vector<32x64xf32>
    %c64 = arith.constant 64 : index
    %c0_50 = arith.constant 0 : index
    %68 = vector.load %arg11[%c64, %c0_50] : memref<192x64xf32, #tpu.memory_space<vmem>>, vector<64x64xf32>
    %cst_51 = arith.constant dense<0.000000e+00> : vector<32x64xf32>
    %69 = tpu.matmul %63, %68, %cst_51 {dimension_numbers = #tpu.dot_dimension_numbers<[1], [0], [0], [1], [0, 0, 1, 1], [], []>} : vector<32x64xf32>, vector<64x64xf32>, vector<32x64xf32> -> vector<32x64xf32>
    %c32 = arith.constant 32 : index
    %c0_52 = arith.constant 0 : index
    %70 = vector.load %arg12[%c32, %c0_52] : memref<96x32xf32, #tpu.memory_space<vmem>>, vector<32x32xf32>
    %cst_53 = arith.constant dense<0.000000e+00> : vector<32x64xf32>
    %71 = tpu.matmul %70, %69, %cst_53 {dimension_numbers = #tpu.dot_dimension_numbers<[1], [0], [0], [1], [0, 0, 1, 1], [], []>} : vector<32x32xf32>, vector<32x64xf32>, vector<32x64xf32> -> vector<32x64xf32>
    %c128 = arith.constant 128 : index
    %c0_54 = arith.constant 0 : index
    %72 = vector.load %arg11[%c128, %c0_54] : memref<192x64xf32, #tpu.memory_space<vmem>>, vector<64x64xf32>
    %cst_55 = arith.constant dense<0.000000e+00> : vector<32x64xf32>
    %73 = tpu.matmul %63, %72, %cst_55 {dimension_numbers = #tpu.dot_dimension_numbers<[1], [0], [0], [1], [0, 0, 1, 1], [], []>} : vector<32x64xf32>, vector<64x64xf32>, vector<32x64xf32> -> vector<32x64xf32>
    %c64_56 = arith.constant 64 : index
    %c0_57 = arith.constant 0 : index
    %74 = vector.load %arg12[%c64_56, %c0_57] : memref<96x32xf32, #tpu.memory_space<vmem>>, vector<32x32xf32>
    %cst_58 = arith.constant dense<0.000000e+00> : vector<32x64xf32>
    %75 = tpu.matmul %74, %73, %cst_58 {dimension_numbers = #tpu.dot_dimension_numbers<[1], [0], [0], [1], [0, 0, 1, 1], [], []>} : vector<32x32xf32>, vector<32x64xf32>, vector<32x64xf32> -> vector<32x64xf32>
    %76 = arith.addf %67, %71 : vector<32x64xf32>
    %77 = arith.addf %76, %75 : vector<32x64xf32>
    %c0_59 = arith.constant 0 : index
    %c0_60 = arith.constant 0 : index
    %78 = vector.load %arg13[%c0_59, %c0_60] : memref<1x4xf32, #tpu.memory_space<vmem>>, vector<1x4xf32>
    %c0_61 = arith.constant 0 : index
    %c0_62 = arith.constant 0 : index
    %79 = vector.load %arg14[%c0_61, %c0_62] : memref<1x4xf32, #tpu.memory_space<vmem>>, vector<1x4xf32>
    %c0_63 = arith.constant 0 : index
    %c0_64 = arith.constant 0 : index
    %80 = vector.load %arg15[%c0_63, %c0_64] : memref<64x4xf32, #tpu.memory_space<vmem>>, vector<64x4xf32>
    %c0_65 = arith.constant 0 : index
    %c0_66 = arith.constant 0 : index
    %81 = vector.load %arg16[%c0_65, %c0_66] : memref<4x64xf32, #tpu.memory_space<vmem>>, vector<4x64xf32>
    %cst_67 = arith.constant 1.000000e+00 : f32
    %82 = vector.broadcast %cst_67 : f32 to vector<1x32xf32>
    %cst_68 = arith.constant dense<0.000000e+00> : vector<1x64xf32>
    %83 = tpu.matmul %82, %77, %cst_68 {dimension_numbers = #tpu.dot_dimension_numbers<[1], [0], [0], [1], [0, 0, 1, 1], [], []>} : vector<1x32xf32>, vector<32x64xf32>, vector<1x64xf32> -> vector<1x64xf32>
    %cst_69 = arith.constant dense<0.000000e+00> : vector<1x4xf32>
    %84 = tpu.matmul %83, %80, %cst_69 {dimension_numbers = #tpu.dot_dimension_numbers<[1], [0], [0], [1], [0, 0, 1, 1], [], []>} : vector<1x64xf32>, vector<64x4xf32>, vector<1x4xf32> -> vector<1x4xf32>
    %cst_70 = arith.constant 0.001953125 : f32
    %85 = vector.broadcast %cst_70 : f32 to vector<1x4xf32>
    %86 = arith.mulf %84, %85 : vector<1x4xf32>
    %cst_71 = arith.constant dense<0.000000e+00> : vector<1x64xf32>
    %87 = tpu.matmul %86, %81, %cst_71 {dimension_numbers = #tpu.dot_dimension_numbers<[1], [0], [0], [1], [0, 0, 1, 1], [], []>} : vector<1x4xf32>, vector<4x64xf32>, vector<1x64xf32> -> vector<1x64xf32>
    %88 = vector.broadcast %87 : vector<1x64xf32> to vector<32x64xf32>
    %89 = arith.subf %77, %88 : vector<32x64xf32>
    %90 = arith.mulf %89, %89 : vector<32x64xf32>
    %cst_72 = arith.constant dense<0.000000e+00> : vector<1x64xf32>
    %91 = tpu.matmul %82, %90, %cst_72 {dimension_numbers = #tpu.dot_dimension_numbers<[1], [0], [0], [1], [0, 0, 1, 1], [], []>} : vector<1x32xf32>, vector<32x64xf32>, vector<1x64xf32> -> vector<1x64xf32>
    %cst_73 = arith.constant dense<0.000000e+00> : vector<1x4xf32>
    %92 = tpu.matmul %91, %80, %cst_73 {dimension_numbers = #tpu.dot_dimension_numbers<[1], [0], [0], [1], [0, 0, 1, 1], [], []>} : vector<1x64xf32>, vector<64x4xf32>, vector<1x4xf32> -> vector<1x4xf32>
    %cst_74 = arith.constant 0.001953125 : f32
    %93 = vector.broadcast %cst_74 : f32 to vector<1x4xf32>
    %94 = arith.mulf %92, %93 : vector<1x4xf32>
    %cst_75 = arith.constant 9.99999974E-6 : f32
    %95 = vector.broadcast %cst_75 : f32 to vector<1x4xf32>
    %96 = arith.addf %94, %95 : vector<1x4xf32>
    %97 = math.rsqrt %96 : vector<1x4xf32>
    %98 = arith.mulf %78, %97 : vector<1x4xf32>
    %cst_76 = arith.constant dense<0.000000e+00> : vector<1x64xf32>
    %99 = tpu.matmul %98, %81, %cst_76 {dimension_numbers = #tpu.dot_dimension_numbers<[1], [0], [0], [1], [0, 0, 1, 1], [], []>} : vector<1x4xf32>, vector<4x64xf32>, vector<1x64xf32> -> vector<1x64xf32>
    %cst_77 = arith.constant dense<0.000000e+00> : vector<1x64xf32>
    %100 = tpu.matmul %79, %81, %cst_77 {dimension_numbers = #tpu.dot_dimension_numbers<[1], [0], [0], [1], [0, 0, 1, 1], [], []>} : vector<1x4xf32>, vector<4x64xf32>, vector<1x64xf32> -> vector<1x64xf32>
    %101 = vector.broadcast %99 : vector<1x64xf32> to vector<32x64xf32>
    %102 = arith.mulf %89, %101 : vector<32x64xf32>
    %103 = vector.broadcast %100 : vector<1x64xf32> to vector<32x64xf32>
    %104 = arith.addf %102, %103 : vector<32x64xf32>
    %cst_78 = arith.constant 0.000000e+00 : f32
    %105 = vector.broadcast %cst_78 : f32 to vector<32x64xf32>
    %106 = arith.maximumf %104, %105 : vector<32x64xf32>
    %c0_79 = arith.constant 0 : index
    %c0_80 = arith.constant 0 : index
    %107 = vector.load %arg17[%c0_79, %c0_80] : memref<64x256xf32, #tpu.memory_space<vmem>>, vector<64x256xf32>
    %cst_81 = arith.constant dense<0.000000e+00> : vector<32x256xf32>
    %108 = tpu.matmul %106, %107, %cst_81 {dimension_numbers = #tpu.dot_dimension_numbers<[1], [0], [0], [1], [0, 0, 1, 1], [], []>} : vector<32x64xf32>, vector<64x256xf32>, vector<32x256xf32> -> vector<32x256xf32>
    %109 = arith.addf %108, %34 : vector<32x256xf32>
    %110 = vector.shape_cast %109 : vector<32x256xf32> to vector<2x16x256xf32>
    %c0_82 = arith.constant 0 : index
    %c0_83 = arith.constant 0 : index
    %c0_84 = arith.constant 0 : index
    %111 = vector.load %arg18[%c0_82, %c0_83, %c0_84] : memref<2x16x256xf32, #tpu.memory_space<vmem>>, vector<2x16x256xf32>
    tpu.vector_store %arg18[%c0_82, %c0_83, %c0_84], %110 {strides = array<i32>} : memref<2x16x256xf32, #tpu.memory_space<vmem>>, vector<2x16x256xf32>,
    return
  }
  func.func @transform_0(%arg0: i32) -> (i32, i32, i32) {
    %c0_i32 = arith.constant 0 : i32
    %c0_i32_0 = arith.constant 0 : i32
    %c0_i32_1 = arith.constant 0 : i32
    %c0_i32_2 = arith.constant 0 : i32
    return %c0_i32, %c0_i32_0, %c0_i32_1 : i32, i32, i32
  }
  func.func @transform_1(%arg0: i32) -> (i32, i32) {
    %c0_i32 = arith.constant 0 : i32
    %c0_i32_0 = arith.constant 0 : i32
    %c0_i32_1 = arith.constant 0 : i32
    return %c0_i32, %c0_i32_0 : i32, i32
  }
  func.func @transform_2(%arg0: i32) -> (i32, i32) {
    %c0_i32 = arith.constant 0 : i32
    %c0_i32_0 = arith.constant 0 : i32
    %c0_i32_1 = arith.constant 0 : i32
    return %c0_i32, %c0_i32_0 : i32, i32
  }
  func.func @transform_3(%arg0: i32) -> (i32, i32) {
    %c0_i32 = arith.constant 0 : i32
    %c0_i32_0 = arith.constant 0 : i32
    %c0_i32_1 = arith.constant 0 : i32
    return %c0_i32, %c0_i32_0 : i32, i32
  }
  func.func @transform_4(%arg0: i32) -> (i32, i32) {
    %c0_i32 = arith.constant 0 : i32
    %c0_i32_0 = arith.constant 0 : i32
    %c0_i32_1 = arith.constant 0 : i32
    return %c0_i32, %c0_i32_0 : i32, i32
  }
  func.func @transform_5(%arg0: i32) -> (i32, i32) {
    %c0_i32 = arith.constant 0 : i32
    %c0_i32_0 = arith.constant 0 : i32
    %c0_i32_1 = arith.constant 0 : i32
    return %c0_i32, %c0_i32_0 : i32, i32
  }
  func.func @transform_6(%arg0: i32) -> (i32, i32) {
    %c0_i32 = arith.constant 0 : i32
    %c0_i32_0 = arith.constant 0 : i32
    %c0_i32_1 = arith.constant 0 : i32
    return %c0_i32, %c0_i32_0 : i32, i32
  }
  func.func @transform_7(%arg0: i32) -> (i32, i32) {
    %c0_i32 = arith.constant 0 : i32
    %c0_i32_0 = arith.constant 0 : i32
    %c0_i32_1 = arith.constant 0 : i32
    return %c0_i32, %c0_i32_0 : i32, i32
  }
  func.func @transform_8(%arg0: i32) -> (i32, i32) {
    %c0_i32 = arith.constant 0 : i32
    %c0_i32_0 = arith.constant 0 : i32
    %c0_i32_1 = arith.constant 0 : i32
    return %c0_i32, %c0_i32_0 : i32, i32
  }
  func.func @transform_9(%arg0: i32) -> (i32, i32) {
    %c0_i32 = arith.constant 0 : i32
    %c0_i32_0 = arith.constant 0 : i32
    %c0_i32_1 = arith.constant 0 : i32
    return %c0_i32, %c0_i32_0 : i32, i32
  }
  func.func @transform_10(%arg0: i32) -> (i32, i32) {
    %c0_i32 = arith.constant 0 : i32
    %c0_i32_0 = arith.constant 0 : i32
    %c0_i32_1 = arith.constant 0 : i32
    return %c0_i32, %c0_i32_0 : i32, i32
  }
  func.func @transform_11(%arg0: i32) -> (i32, i32) {
    %c0_i32 = arith.constant 0 : i32
    %c0_i32_0 = arith.constant 0 : i32
    %c0_i32_1 = arith.constant 0 : i32
    return %c0_i32, %c0_i32_0 : i32, i32
  }
  func.func @transform_12(%arg0: i32) -> (i32, i32) {
    %c0_i32 = arith.constant 0 : i32
    %c0_i32_0 = arith.constant 0 : i32
    %c0_i32_1 = arith.constant 0 : i32
    return %c0_i32, %c0_i32_0 : i32, i32
  }
  func.func @transform_13(%arg0: i32) -> (i32, i32) {
    %c0_i32 = arith.constant 0 : i32
    %c0_i32_0 = arith.constant 0 : i32
    %c0_i32_1 = arith.constant 0 : i32
    return %c0_i32, %c0_i32_0 : i32, i32
  }
  func.func @transform_14(%arg0: i32) -> (i32, i32) {
    %c0_i32 = arith.constant 0 : i32
    %c0_i32_0 = arith.constant 0 : i32
    %c0_i32_1 = arith.constant 0 : i32
    return %c0_i32, %c0_i32_0 : i32, i32
  }
  func.func @transform_15(%arg0: i32) -> (i32, i32) {
    %c0_i32 = arith.constant 0 : i32
    %c0_i32_0 = arith.constant 0 : i32
    %c0_i32_1 = arith.constant 0 : i32
    return %c0_i32, %c0_i32_0 : i32, i32
  }
  func.func @transform_16(%arg0: i32) -> (i32, i32) {
    %c0_i32 = arith.constant 0 : i32
    %c0_i32_0 = arith.constant 0 : i32
    %c0_i32_1 = arith.constant 0 : i32
    return %c0_i32, %c0_i32_0 : i32, i32
  }
  func.func @transform_17(%arg0: i32) -> (i32, i32, i32) {
    %c0_i32 = arith.constant 0 : i32
    %c0_i32_0 = arith.constant 0 : i32
    %c0_i32_1 = arith.constant 0 : i32
    %c0_i32_2 = arith.constant 0 : i32
    return %c0_i32, %c0_i32_0, %c0_i32_1 : i32, i32, i32
  }
}

</mosaic_0001>

<bundles_post_ra>
// kernel: tpu_custom_call.1
= control target key start
LH: loop header
LB: loop body
LE: loop exit
PB: predicated region body
PF: predicated region fallthrough
CT: control target
= control target key end

     0   :  { %s4344_s0 = inlined_call_operand.vmem [shape: f32[2,16,64], index: 0, kind: input, shape index: {}]   ;;  %s4345_s1 = inlined_call_operand.vmem [shape: f32[1,4], index: 1, kind: input, shape index: {}]   ;;  %s4346_s2 = inlined_call_operand.vmem [shape: f32[1,4], index: 2, kind: input, shape index: {}]   ;;  %s4347_s3 = inlined_call_operand.vmem [shape: f32[64,4], index: 3, kind: input, shape index: {}]   ;;  %s4348_s4 = inlined_call_operand.vmem [shape: f32[4,64], index: 4, kind: input, shape index: {}]   ;;  %s4349_s5 = inlined_call_operand.vmem [shape: f32[64,320], index: 5, kind: input, shape index: {}]   ;;  %s4350_s6 = inlined_call_operand.vmem [shape: f32[1,4], index: 6, kind: input, shape index: {}]   ;;  %s4351_s7 = inlined_call_operand.vmem [shape: f32[1,4], index: 7, kind: input, shape index: {}]   ;;  %s4352_s8 = inlined_call_operand.vmem [shape: f32[64,4], index: 8, kind: input, shape index: {}]   ;;  %s4353_s9 = inlined_call_operand.vmem [shape: f32[4,64], index: 9, kind: input, shape index: {}]   ;;  %s4354_s10 = inlined_call_operand.vmem [shape: f32[192,64], index: 10, kind: input, shape index: {}]   ;;  %s4355_s11 = inlined_call_operand.vmem [shape: f32[96,32], index: 11, kind: input, shape index: {}]   ;;  %s4356_s12 = inlined_call_operand.vmem [shape: f32[1,4], index: 12, kind: input, shape index: {}]   ;;  %s4357_s13 = inlined_call_operand.vmem [shape: f32[1,4], index: 13, kind: input, shape index: {}]   ;;  %s4358_s14 = inlined_call_operand.vmem [shape: f32[64,4], index: 14, kind: input, shape index: {}]   ;;  %s4359_s15 = inlined_call_operand.vmem [shape: f32[4,64], index: 15, kind: input, shape index: {}]   ;;  %s4360_s16 = inlined_call_operand.vmem [shape: f32[64,256], index: 16, kind: input, shape index: {}]   ;;  %s4361_s17 = inlined_call_operand.hbm [shape: f32[2,16,256], index: 17, kind: output, shape index: {}]  }
   0x1   :  { %4363 = sst [smem:[#allocation5_spill]] %s4344_s0 }
   0x2   :  { %4364 = sst [smem:[#allocation6_spill]] %s4345_s1 }
   0x3   :  { %s4365_s26 = sld [smem:[#allocation5_spill]]  ;;  %v3606_v3 = vmov 0.0|0.0   ;;  %vm3607_vm0 = vmmov 0   ;;  %v3608_v6 = vmov 0.0   ;;  %v63_v8 = vld [vmem:[%s4347_s3] sm:$0xff]  ;;  %v64_v9 = vld [vmem:[%s4347_s3 + $0x8] sm:$0xff] }
   0x4   :  { %3332 = vmatprep.subr.bf16.mxu1 %v3606_v3  ;;  %2985 = vmatprep.mubr.msk.f32.mxu1 %vm3607_vm0, %v3608_v6 }
   0x5   :  { %3350 = vmatprep.subr.bf16.mxu0 %v3606_v3  ;;  %3020 = vmatprep.mubr.msk.f32.mxu0 %vm3607_vm0, %v3608_v6 }
   0x9   :  { %v3707_v0 = vld [vmem:[%s4365_s26] sm:$0xff]  ;;  %v3712_v1 = vld [vmem:[%s4365_s26 + $0x8] sm:$0xff]  ;;  %v3717_v2 = vld [vmem:[%s4365_s26 + $0x10] sm:$0xff] }
   0xa   :  { %v3333_v4 = vpack.c.bf16 %v3712_v1, %v3707_v0  ;;  %v3725_v5 = vld [vmem:[%s4365_s26 + $0x18] sm:$0xff] }
   0xb   :  { %v3336_v7 = vpack.c.bf16 %v3725_v5, %v3717_v2 }
   0xc   :  { %3334 = vmatpush3.bf16.msra.mxu1 %v3333_v4 }
   0xd   :  { %3335 = vmatprep.subr.bf16.mxu1 %v3606_v3 }
   0xe   :  { %22 = vsyncpa [#allocation3], 0  ;;  %vm72_vm1 = vcmask 261120   ;;  %v3339_v10 = vpack.c.bf16 %v64_v9, %v63_v8  ;;  %v65_v11 = vld [vmem:[%s4347_s3 + $0x10] sm:$0xff]  ;;  %v66_v12 = vld [vmem:[%s4347_s3 + $0x18] sm:$0xff]  ;;  %v3609_v13 = vmov 1.0   ;;  %v299_v27 = vlaneseq }
   0xf   :  { %v3342_v14 = vpack.c.bf16 %v66_v12, %v65_v11  ;;  %v67_v15 = vld [vmem:[%s4347_s3 + $0x20] sm:$0xff]  ;;  %v68_v16 = vld [vmem:[%s4347_s3 + $0x28] sm:$0xff]  ;;  %v69_v18 = vld [vmem:[%s4347_s3 + $0x30] sm:$0xff]  ;;  %vm146_vm2 = vcmask 523264   ;;  %vm225_vm3 = vcmask 1043456   ;;  %vm221_vm4 = vcmask 31744  }
  0x10   :  { %3337 = vmatpush3.bf16.msra.mxu1 %v3336_v7  ;;  %v3345_v17 = vpack.c.bf16 %v68_v16, %v67_v15  ;;  %v70_v19 = vld [vmem:[%s4347_s3 + $0x38] sm:$0xff]  ;;  %v3774_v23 = vld [vmem:[%s4348_s4] sm:$0xf]  ;;  %v300_v28 = vshrl.u32 %v299_v27, 7  ;;  %v626_v45 = vld [vmem:[%s4349_s5 + $0x10] sm:$0xff]  ;;  %s4366_s25 = sld [smem:[#allocation6_spill]] }
  0x11   :  { %3338 = vmatprep.subr.bf16.mxu1 %v3606_v3  ;;  %v3348_v20 = vpack.c.bf16 %v70_v19, %v69_v18  ;;  %v629_v46 = vld [vmem:[%s4349_s5 + $0x28] sm:$0xff]  ;;  %v628_v54 = vld [vmem:[%s4349_s5 + $0x20] sm:$0xff]  ;;  %v627_v59 = vld [vmem:[%s4349_s5 + $0x18] sm:$0xff] }
  0x12   :  { %v3785_v29 = vsub.s32 0, %v300_v28  ;;  %v3384_v47 = vpack.c.bf16 %v629_v46, %v626_v45  ;;  %v625_v53 = vld [vmem:[%s4349_s5 + $0x8] sm:$0xff]  ;;  %v624_v58 = vld [vmem:[%s4349_s5] sm:$0xff]  ;;  %v631_v60 = vld [vmem:[%s4349_s5 + $0x38] sm:$0xff] }
  0x13   :  { %2986 = vmatmul.mubr.msk.f32.vlgmr.msra.gmra.mrb[0].mxu1 %vm72_vm1, %v3609_v13  ;;  %v3368_v57 = vpack.c.bf16 %v628_v54, %v625_v53  ;;  %v634_v61 = vld [vmem:[%s4349_s5 + $0x50] sm:$0xff]  ;;  %v62_v62 = vld [vmem:[%s4346_s2] sm:$0x1]  ;;  %v3370_v63 = vpack.c.bf16 %v627_v59, %v624_v58  ;;  %v635_v7 = vld [vmem:[%s4349_s5 + $0x58] sm:$0xff] }
  0x14   :  { %3340 = vmatpush3.bf16.msra.mxu1 %v3339_v10  ;;  %3004 = vmatprep.mubr.msk.f32.mxu1 %vm3607_vm0, %v3608_v6  ;;  %v632_v4 = vld [vmem:[%s4349_s5 + $0x40] sm:$0xff]  ;;  %v637_v9 = vld [vmem:[%s4349_s5 + $0x68] sm:$0xff]  ;;  %v638_v15 = vld [vmem:[%s4349_s5 + $0x70] sm:$0xff] }
  0x15   :  { %3341 = vmatprep.subr.bf16.mxu1 %v3606_v3  ;;  %v3388_v8 = vpack.c.bf16 %v635_v7, %v632_v4  ;;  %v636_v12 = vld [vmem:[%s4349_s5 + $0x60] sm:$0xff]  ;;  %v643_v19 = vld [vmem:[%s4349_s5 + $0x98] sm:$0xff]  ;;  %v837_v58 = vld [vmem:[%s4352_s8 + $0x8] sm:$0xff] }
  0x16   :  { %v61_v52 = vld [vmem:[%s4366_s25] sm:$0x1]  ;;  %v838_v59 = vld [vmem:[%s4352_s8 + $0x10] sm:$0xff] }
  0x18   :  { %3343 = vmatpush3.bf16.msra.mxu1 %v3342_v14 }
  0x19   :  { %3344 = vmatprep.subr.bf16.mxu1 %v3606_v3 }
  0x1c   :  { %3346 = vmatpush3.bf16.msra.mxu1 %v3345_v17 }
  0x1d   :  { %3347 = vmatprep.subr.bf16.mxu1 %v3606_v3 }
  0x20   :  { %3349 = vmatpush3.bf16.msra.mxu1 %v3348_v20 }
  0x21   :  { %3007 = vmatprep.subr.mxu1 %v3608_v6 }
  0xe6   :  { %v142_v21 = vpop.f32.mrb[0].mxu1 }
  0xe7   :  { %v2987_v22 = vpop.f32.mrb[1].mxu1  ;;  %3005 = vmatmul.mubr.msk.f32.vlgmr.msra.gmra.mrb[2].mxu1 %vm146_vm2, %v142_v21 }
  0xe8   :  { %3009 = vmatprep.mubr.msk.f32.mxu1 %vm3607_vm0, %v3608_v6  ;;  %3008 = vmatpush3.msk.msra.mxu1 %vm225_vm3, %v3774_v23  ;;  %v642_v22 = vld [vmem:[%s4349_s5 + $0x90] sm:$0xff] }
  0xe9   :  { %3356 = vmatprep.subr.bf16.mxu1 %v3606_v3 }
 0x1ba   :  { %v216_v24 = vpop.f32.mrb[2].mxu1 }
 0x1bb   :  { %v220_v25 = vmul.f32 0.001953125, %v216_v24  ;;  %v3006_v26 = vpop.f32.mrb[3].mxu1  ;;  %v644_v24 = vld [vmem:[%s4349_s5 + $0xa0] sm:$0xff] }
 0x1bc   :  { %v647_v26 = vld [vmem:[%s4349_s5 + $0xb8] sm:$0xff] }
 0x1bd   :  { %3010 = vmatmul.mubr.msk.f32.vlgmr.msra.gmra.mrb[4].mxu1 %vm221_vm4, %v220_v25  ;;  %v3396_v27 = vpack.c.bf16 %v647_v26, %v644_v24 }
 0x1be   :  { %3358 = vmatpush3.bf16.msra.mxu1 %v3339_v10  ;;  %3039 = vmatprep.mubr.msk.f32.mxu1 %vm3607_vm0, %v3608_v6  ;;  %v640_v10 = vld [vmem:[%s4349_s5 + $0x80] sm:$0xff] }
 0x1bf   :  { %3359 = vmatprep.subr.bf16.mxu1 %v3606_v3  ;;  %v3376_v11 = vpack.c.bf16 %v640_v10, %v637_v9  ;;  %v843_v9 = vld [vmem:[%s4352_s8 + $0x38] sm:$0xff] }
 0x1c2   :  { %3361 = vmatpush3.bf16.msra.mxu1 %v3342_v14  ;;  %v639_v14 = vld [vmem:[%s4349_s5 + $0x78] sm:$0xff] }
 0x1c3   :  { %3362 = vmatprep.subr.bf16.mxu1 %v3606_v3  ;;  %v3378_v16 = vpack.c.bf16 %v639_v14, %v636_v12  ;;  %v844_v14 = vld [vmem:[%s4353_s9] sm:$0xf] }
 0x1c6   :  { %3364 = vmatpush3.bf16.msra.mxu1 %v3345_v17  ;;  %v641_v17 = vld [vmem:[%s4349_s5 + $0x88] sm:$0xff] }
 0x1c7   :  { %3365 = vmatprep.subr.bf16.mxu1 %v3606_v3  ;;  %v3392_v18 = vpack.c.bf16 %v641_v17, %v638_v15 }
 0x1ca   :  { %3367 = vmatpush3.bf16.msra.mxu1 %v3348_v20  ;;  %v646_v20 = vld [vmem:[%s4349_s5 + $0xb0] sm:$0xff] }
 0x1cb   :  { %3385 = vmatprep.subr.bf16.mxu1 %v3384_v47  ;;  %v3380_v21 = vpack.c.bf16 %v646_v20, %v643_v19 }
 0x290   :  { %v295_v30 = vpop.f32.mrb[4].mxu1 }
 0x291   :  { %v302_v31 = vrot.slane %v295_v30, %v3785_v29  ;;  %v3011_v32 = vpop.f32.mrb[5].mxu1 }
 0x293   :  { %v3789_v33 = vsub.f32 %v3707_v0, %v302_v31  ;;  %v3792_v34 = vsub.f32 %v3712_v1, %v302_v31  ;;  %v3795_v35 = vsub.f32 %v3717_v2, %v302_v31  ;;  %v3798_v36 = vsub.f32 %v3725_v5, %v302_v31  ;;  %v630_v1 = vld [vmem:[%s4349_s5 + $0x30] sm:$0xff]  ;;  %v633_v2 = vld [vmem:[%s4349_s5 + $0x48] sm:$0xff] }
 0x294   :  { %v3372_v0 = vpack.c.bf16 %v634_v61, %v631_v60  ;;  %v3374_v5 = vpack.c.bf16 %v633_v2, %v630_v1  ;;  %v840_v1 = vld [vmem:[%s4352_s8 + $0x20] sm:$0xff]  ;;  %v841_v2 = vld [vmem:[%s4352_s8 + $0x28] sm:$0xff] }
 0x295   :  { %v307_v37 = vmul.f32 %v3789_v33, %v3789_v33  ;;  %v308_v38 = vmul.f32 %v3792_v34, %v3792_v34  ;;  %v309_v40 = vmul.f32 %v3795_v35, %v3795_v35  ;;  %v310_v41 = vmul.f32 %v3798_v36, %v3798_v36 }
 0x296   :  { %v3413_v7 = vpack.c.bf16 %v841_v2, %v840_v1  ;;  %v1693_v2 = vld [vmem:[%s4354_s10 + $0x80] sm:$0xff] }
 0x297   :  { %v3351_v39 = vpack.c.bf16 %v308_v38, %v307_v37  ;;  %v3354_v42 = vpack.c.bf16 %v310_v41, %v309_v40 }
 0x299   :  { %3352 = vmatpush3.bf16.msra.mxu0 %v3351_v39 }
 0x29a   :  { %3353 = vmatprep.subr.bf16.mxu0 %v3606_v3 }
 0x29d   :  { %3355 = vmatpush3.bf16.msra.mxu0 %v3354_v42 }
 0x29e   :  { %3042 = vmatprep.subr.mxu0 %v3608_v6 }
 0x2a0   :  { %3021 = vmatmul.mubr.msk.f32.vlgmr.msra.gmra.mrb[0].mxu0 %vm72_vm1, %v3609_v13 }
 0x2a1   :  { %3043 = vmatpush3.msk.msra.mxu0 %vm225_vm3, %v3774_v23  ;;  %3044 = vmatprep.mubr.msk.f32.mxu0 %vm3607_vm0, %v3608_v6 }
 0x2a2   :  { %3047 = vmatprep.subr.mxu0 %v3608_v6 }
 0x373   :  { %v377_v43 = vpop.f32.mrb[0].mxu0 }
 0x374   :  { %v3022_v44 = vpop.f32.mrb[1].mxu0  ;;  %3040 = vmatmul.mubr.msk.f32.vlgmr.msra.gmra.mrb[6].mxu1 %vm146_vm2, %v377_v43 }
 0x375   :  { %3387 = vmatpush3.bf16.msra.mxu1 %v3384_v47 }
 0x376   :  { %3389 = vmatprep.subr.bf16.mxu1 %v3388_v8 }
 0x379   :  { %3391 = vmatpush3.bf16.msra.mxu1 %v3388_v8  ;;  %v842_v8 = vld [vmem:[%s4352_s8 + $0x30] sm:$0xff] }
 0x37a   :  { %3393 = vmatprep.subr.bf16.mxu1 %v3392_v18  ;;  %v3416_v10 = vpack.c.bf16 %v843_v9, %v842_v8 }
 0x37d   :  { %3395 = vmatpush3.bf16.msra.mxu1 %v3392_v18 }
 0x37e   :  { %3397 = vmatprep.subr.bf16.mxu1 %v3396_v27 }
 0x381   :  { %3399 = vmatpush3.bf16.msra.mxu1 %v3396_v27 }
 0x382   :  { %3400 = vmatprep.subr.bf16.mxu1 %v3606_v3 }
 0x447   :  { %v450_v48 = vpop.f32.mrb[6].mxu1 }
 0x448   :  { %v454_v49 = vmul.f32 0.001953125, %v450_v48  ;;  %v3041_v50 = vpop.f32.mrb[7].mxu1 }
 0x44a   :  { %v455_v51 = vadd.f32 1e-05, %v454_v49 }
 0x44c   :  { %3576 = vrsqrt.f32 %v455_v51 }
 0x456   :  { %v3577_v55 = vpop.eup %3576 }
 0x457   :  { %v457_v56 = vmul.f32 %v3577_v55, %v61_v52 }
 0x459   :  { %3045 = vmatmul.mubr.msk.f32.vlgmr.msra.gmra.mrb[2].mxu0 %vm221_vm4, %v457_v56 }
 0x45a   :  { %3048 = vmatpush3.msk.msra.mxu0 %vm225_vm3, %v3774_v23  ;;  %3049 = vmatprep.mubr.msk.f32.mxu0 %vm3607_vm0, %v3608_v6  ;;  %v645_v23 = vld [vmem:[%s4349_s5 + $0xa8] sm:$0xff]  ;;  %s3610_s5 = smov 64  }
 0x45b   :  { %3369 = vmatprep.subr.bf16.mxu0 %v3368_v57  ;;  %v3382_v25 = vpack.c.bf16 %v645_v23, %v642_v22  ;;  %v836_v57 = vld [vmem:[%s4352_s8] sm:$0xff] }
 0x45c   :  { %v3407_v61 = vpack.c.bf16 %v837_v58, %v836_v57  ;;  %v1394_v57 = vld [vmem:[%s4354_s10 + $0x20] sm:$0xff]  ;;  %v1395_v58 = vld [vmem:[%s4354_s10 + $0x28] sm:$0xff] }
 0x45d   :  { %3050 = vmatmul.mubr.msk.f32.vlgmr.msra.gmra.mrb[4].mxu0 %vm221_vm4, %v62_v62  ;;  %v839_v62 = vld [vmem:[%s4352_s8 + $0x18] sm:$0xff] }
 0x45e   :  { %3371 = vmatpush1.bf16.msra.mxu0 %v3370_v63  ;;  %724 = vmatprep.mubr.f32.mxu0 %v3608_v6  ;;  %v3410_v63 = vpack.c.bf16 %v839_v62, %v838_v59  ;;  %v3444_v59 = vpack.c.bf16 %v1395_v58, %v1394_v57 }
 0x45f   :  { %3373 = vmatprep.subr.bf16.mxu0 %v3372_v0 }
 0x462   :  { %3375 = vmatpush1.bf16.msra.mxu0 %v3374_v5 }
 0x463   :  { %3377 = vmatprep.subr.bf16.mxu0 %v3376_v11 }
 0x466   :  { %3379 = vmatpush1.bf16.msra.mxu0 %v3378_v16 }
 0x467   :  { %3381 = vmatprep.subr.bf16.mxu0 %v3380_v21 }
 0x46a   :  { %3383 = vmatpush1.bf16.msra.mxu0 %v3382_v25 }
 0x46b   :  { %3406 = vmatprep.subr.bf16.mxu0 %v3606_v3 }
 0x52c   :  { %v527_v28 = vpop.f32.mrb[2].mxu0 }
 0x52d   :  { %v607_v30 = vrot.slane %v527_v28, %v3785_v29  ;;  %v3046_v31 = vpop.f32.mrb[3].mxu0 }
 0x52f   :  { %v608_v32 = vmul.f32 %v607_v30, %v3789_v33  ;;  %v609_v38 = vmul.f32 %v607_v30, %v3792_v34  ;;  %v610_v39 = vmul.f32 %v607_v30, %v3795_v35  ;;  %v611_v40 = vmul.f32 %v607_v30, %v3798_v36 }
 0x530   :  { %v600_v37 = vpop.f32.mrb[4].mxu0 }
 0x531   :  { %v615_v41 = vrot.slane %v600_v37, %v3785_v29  ;;  %v3051_v42 = vpop.f32.mrb[5].mxu0 }
 0x532   :  { %v1502_v42 = vld [vmem:[%s4354_s10 + $0x58] sm:$0xff] }
 0x533   :  { %v616_v43 = vadd.f32 %v615_v41, %v608_v32  ;;  %v617_v44 = vadd.f32 %v615_v41, %v609_v38  ;;  %v618_v45 = vadd.f32 %v615_v41, %v610_v39  ;;  %v619_v46 = vadd.f32 %v615_v41, %v611_v40  ;;  %v1499_v38 = vld [vmem:[%s4354_s10 + $0x40] sm:$0xff]  ;;  %v1500_v39 = vld [vmem:[%s4354_s10 + $0x48] sm:$0xff]  ;;  %v1501_v41 = vld [vmem:[%s4354_s10 + $0x50] sm:$0xff] }
 0x534   :  { %v3452_v40 = vpack.c.bf16 %v1500_v39, %v1499_v38  ;;  %v1700_v38 = vld [vmem:[%s4354_s10 + $0xb8] sm:$0xff] }
 0x535   :  { %v620_v47 = vmax.f32 %v616_v43, 0.0  ;;  %v621_v48 = vmax.f32 %v617_v44, 0.0  ;;  %v622_v33 = vmax.f32 %v618_v45, 0.0  ;;  %v623_v34 = vmax.f32 %v619_v46, 0.0 }
 0x536   :  { %v3456_v43 = vpack.c.bf16 %v1502_v42, %v1501_v41 }
 0x537   :  { %2747 = vmatmul.mubr.msk.f32.vlgmr.msra.gmra.mrb[6].mxu0 %vm146_vm2, %v620_v47  ;;  %3068 = vmatprep.mubr.msk.f32.mxu1 %vm146_vm2, %v620_v47 }
 0x538   :  { %3069 = vmatmul.mubr.msk.f32.vlgmr.msra.gmra.mrb[8].mxu1 %vm146_vm2, %v621_v48  ;;  %730 = vmatprep.mubr.f32.mxu0 %v3608_v6 }
 0x539   :  { %3071 = vmatprep.mubr.msk.f32.mxu1 %vm146_vm2, %v622_v33  ;;  %3408 = vmatpush3.bf16.msra.mxu0 %v3407_v61 }
 0x53a   :  { %3409 = vmatprep.subr.bf16.mxu0 %v3606_v3 }
 0x53b   :  { %2748 = vmatmul.mubr.msk.f32.gmra.mrb[8].mxu0 %vm146_vm2, %v621_v48  ;;  %v834_v48 = vld [vmem:[%s4350_s6] sm:$0x1] }
 0x53c   :  { %3072 = vmatmul.mubr.msk.f32.gmra.mrb[10].mxu1 %vm146_vm2, %v623_v34  ;;  %736 = vmatprep.mubr.f32.mxu0 %v3608_v6 }
 0x53d   :  { %3082 = vmatprep.mubr.msk.f32.mxu1 %vm3607_vm0, %v3608_v6  ;;  %3411 = vmatpush3.bf16.msra.mxu0 %v3410_v63 }
 0x53e   :  { %3412 = vmatprep.subr.bf16.mxu0 %v3606_v3 }
 0x53f   :  { %2749 = vmatmul.mubr.msk.f32.gmra.mrb[10].mxu0 %vm146_vm2, %v622_v33  ;;  %v1390_v33 = vld [vmem:[%s4354_s10] sm:$0xff] }
 0x540   :  { %742 = vmatprep.mubr.f32.mxu0 %v3608_v6 }
 0x541   :  { %3414 = vmatpush3.bf16.msra.mxu0 %v3413_v7 }
 0x542   :  { %3415 = vmatprep.subr.bf16.mxu0 %v3606_v3 }
 0x543   :  { %2750 = vmatmul.mubr.msk.f32.gmra.mrb[12].mxu0 %vm146_vm2, %v623_v34  ;;  %v1391_v34 = vld [vmem:[%s4354_s10 + $0x8] sm:$0xff] }
 0x544   :  { %3101 = vmatprep.mubr.msk.f32.mxu0 %vm3607_vm0, %v3608_v6 }
 0x545   :  { %3417 = vmatpush3.bf16.msra.mxu0 %v3416_v10 }
 0x546   :  { %3418 = vmatprep.subr.bf16.mxu0 %v3606_v3 }
 0x60a   :  { %v3926_v35 = vpop.f32.mrb[6].mxu0 }
 0x60b   :  { %2572 = vrot.lane.b32.xlu0 %v3926_v35, %s3610_s5  ;;  %v728_v36 = vpop.f32.mrb[7].mxu0  ;;  %v3070_v49 = vpop.f32.mrb[8].mxu1 }
 0x60c   :  { %2582 = vrot.lane.b32.xlu1 %v3070_v49, %s3610_s5  ;;  %v815_v50 = vpop.f32.mrb[9].mxu1  ;;  %v3436_v49 = vpack.c.bf16 %v1391_v34, %v1390_v33 }
 0x60e   :  { %v3931_v51 = vpop.f32.mrb[8].mxu0 }
 0x60f   :  { %v3401_v52 = vpack.c.bf16 %v3931_v51, %v3926_v35  ;;  %2574 = vrot.lane.b32.xlu0 %v728_v36, %s3610_s5  ;;  %v734_v53 = vpop.f32.mrb[9].mxu0  ;;  %v3073_v54 = vpop.f32.mrb[10].mxu1 }
 0x610   :  { %2576 = vrot.lane.b32.xlu1 %v815_v50, %s3610_s5  ;;  %v825_v55 = vpop.f32.mrb[11].mxu1  ;;  %v835_v50 = vld [vmem:[%s4351_s7] sm:$0x1] }
 0x611   :  { %3402 = vmatpush3.bf16.msra.mxu1 %v3401_v52  ;;  %v1393_v52 = vld [vmem:[%s4354_s10 + $0x18] sm:$0xff] }
 0x612   :  { %v738_v56 = vpop.f32.mrb[10].mxu0  ;;  %3403 = vmatprep.subr.bf16.mxu1 %v3606_v3 }
 0x613   :  { %2580 = vrot.lane.b32.xlu0 %v734_v53, %s3610_s5  ;;  %v740_v60 = vpop.f32.mrb[11].mxu0 }
 0x614   :  { %2578 = vrot.lane.b32.xlu1 %v3931_v51, %s3610_s5 }
 0x616   :  { %v744_v0 = vpop.f32.mrb[12].mxu0 }
 0x617   :  { %v3404_v4 = vpack.c.bf16 %v744_v0, %v738_v56  ;;  %v746_v5 = vpop.f32.mrb[13].mxu0  ;;  %2588 = vrot.lane.b32.xlu0 %v825_v55, %s3610_s5  ;;  %v1504_v55 = vld [vmem:[%s4354_s10 + $0x68] sm:$0xff] }
 0x618   :  { %2586 = vrot.lane.b32.xlu1 %v740_v60, %s3610_s5  ;;  %v1505_v60 = vld [vmem:[%s4354_s10 + $0x70] sm:$0xff] }
 0x619   :  { %3405 = vmatpush3.bf16.msra.mxu1 %v3404_v4  ;;  %v1694_v4 = vld [vmem:[%s4354_s10 + $0x88] sm:$0xff] }
 0x61a   :  { %3104 = vmatprep.subr.mxu1 %v3608_v6 }
 0x61b   :  { %2584 = vrot.lane.b32.xlu0 %v738_v56, %s3610_s5 }
 0x61c   :  { %3083 = vmatmul.mubr.msk.f32.vlgmr.msra.gmra.mrb[12].mxu1 %vm72_vm1, %v3609_v13  ;;  %2590 = vrot.lane.b32.xlu1 %v744_v0, %s3610_s5 }
 0x61d   :  { %3106 = vmatprep.mubr.msk.f32.mxu1 %vm3607_vm0, %v3608_v6  ;;  %3105 = vmatpush3.msk.msra.mxu1 %vm225_vm3, %v844_v14 }
 0x61e   :  { %3424 = vmatprep.subr.bf16.mxu1 %v3606_v3 }
 0x61f   :  { %2592 = vrot.lane.b32.xlu0 %v746_v5, %s3610_s5  ;;  %v3476_v5 = vpack.c.bf16 %v1694_v4, %v1693_v2  ;;  %v1990_v2 = vld [vmem:[%s4358_s14] sm:$0xff]  ;;  %v1991_v4 = vld [vmem:[%s4358_s14 + $0x8] sm:$0xff] }
 0x620   :  { %2594 = vrot.lane.b32.xlu1 %v3073_v54, %s3610_s5  ;;  %v1503_v54 = vld [vmem:[%s4354_s10 + $0x60] sm:$0xff] }
 0x6ef   :  { %v911_v11 = vpop.f32.mrb[12].mxu1 }
 0x6f0   :  { %v3084_v12 = vpop.f32.mrb[13].mxu1  ;;  %3102 = vmatmul.mubr.msk.f32.vlgmr.msra.gmra.mrb[14].mxu0 %vm146_vm2, %v911_v11 }
 0x6f1   :  { %3117 = vmatprep.mubr.msk.f32.mxu0 %vm3607_vm0, %v3608_v6 }
 0x7c3   :  { %v984_v15 = vpop.f32.mrb[14].mxu0 }
 0x7c4   :  { %v988_v16 = vmul.f32 0.001953125, %v984_v15  ;;  %v3103_v17 = vpop.f32.mrb[15].mxu0 }
 0x7c6   :  { %3107 = vmatmul.mubr.msk.f32.vlgmr.msra.gmra.mrb[14].mxu1 %vm221_vm4, %v988_v16 }
 0x7c7   :  { %3426 = vmatpush3.bf16.msra.mxu1 %v3407_v61  ;;  %3136 = vmatprep.mubr.msk.f32.mxu1 %vm3607_vm0, %v3608_v6  ;;  %v1506_v61 = vld [vmem:[%s4354_s10 + $0x78] sm:$0xff] }
 0x7c8   :  { %3427 = vmatprep.subr.bf16.mxu1 %v3606_v3  ;;  %v3464_v62 = vpack.c.bf16 %v1506_v61, %v1505_v60  ;;  %v1788_v60 = vld [vmem:[%s4355_s11 + $0x50] sm:$0xff]  ;;  %v1789_v61 = vld [vmem:[%s4355_s11 + $0x58] sm:$0xff] }
 0x7cb   :  { %3429 = vmatpush3.bf16.msra.mxu1 %v3410_v63  ;;  %v1396_v63 = vld [vmem:[%s4354_s10 + $0x30] sm:$0xff] }
 0x7cc   :  { %3430 = vmatprep.subr.bf16.mxu1 %v3606_v3 }
 0x7cf   :  { %3432 = vmatpush3.bf16.msra.mxu1 %v3413_v7 }
 0x7d0   :  { %3433 = vmatprep.subr.bf16.mxu1 %v3606_v3 }
 0x7d3   :  { %3435 = vmatpush3.bf16.msra.mxu1 %v3416_v10 }
 0x7d4   :  { %3453 = vmatprep.subr.bf16.mxu1 %v3452_v40 }
 0x899   :  { %v1061_v18 = vpop.f32.mrb[14].mxu1 }
 0x89a   :  { %v1068_v19 = vrot.slane %v1061_v18, %v3785_v29  ;;  %v3108_v20 = vpop.f32.mrb[15].mxu1 }
 0x89c   :  { %v3996_v21 = vsub.f32 %v3926_v35, %v1068_v19  ;;  %v3999_v22 = vsub.f32 %v3931_v51, %v1068_v19  ;;  %v4001_v23 = vsub.f32 %v738_v56, %v1068_v19  ;;  %v4003_v24 = vsub.f32 %v744_v0, %v1068_v19  ;;  %v1392_v51 = vld [vmem:[%s4354_s10 + $0x10] sm:$0xff]  ;;  %v1397_v0 = vld [vmem:[%s4354_s10 + $0x38] sm:$0xff] }
 0x89d   :  { %v3440_v53 = vpack.c.bf16 %v1393_v52, %v1392_v51  ;;  %v3460_v56 = vpack.c.bf16 %v1504_v55, %v1503_v54  ;;  %v3448_v1 = vpack.c.bf16 %v1397_v0, %v1396_v63  ;;  %v1595_v51 = vld [vmem:[%s4355_s11 + $0x38] sm:$0xff]  ;;  %v1786_v52 = vld [vmem:[%s4355_s11 + $0x40] sm:$0xff]  ;;  %v1496_v63 = vld [vmem:[%s4355_s11 + $0x8] sm:$0xff] }
 0x89e   :  { %v1073_v25 = vmul.f32 %v3996_v21, %v3996_v21  ;;  %v1074_v26 = vmul.f32 %v3999_v22, %v3999_v22  ;;  %v1075_v28 = vmul.f32 %v4001_v23, %v4001_v23  ;;  %v1076_v30 = vmul.f32 %v4003_v24, %v4003_v24  ;;  %v1497_v0 = vld [vmem:[%s4355_s11 + $0x10] sm:$0xff] }
 0x8a0   :  { %v3419_v27 = vpack.c.bf16 %v1074_v26, %v1073_v25  ;;  %v3422_v31 = vpack.c.bf16 %v1076_v30, %v1075_v28  ;;  %v1695_v25 = vld [vmem:[%s4354_s10 + $0x90] sm:$0xff]  ;;  %v1697_v28 = vld [vmem:[%s4354_s10 + $0xa0] sm:$0xff]  ;;  %v1698_v30 = vld [vmem:[%s4354_s10 + $0xa8] sm:$0xff] }
 0x8a2   :  { %3420 = vmatpush3.bf16.msra.mxu0 %v3419_v27 }
 0x8a3   :  { %3421 = vmatprep.subr.bf16.mxu0 %v3606_v3 }
 0x8a6   :  { %3423 = vmatpush3.bf16.msra.mxu0 %v3422_v31 }
 0x8a7   :  { %3139 = vmatprep.subr.mxu0 %v3608_v6 }
 0x8a9   :  { %3118 = vmatmul.mubr.msk.f32.vlgmr.msra.gmra.mrb[16].mxu0 %vm72_vm1, %v3609_v13 }
 0x8aa   :  { %3140 = vmatpush3.msk.msra.mxu0 %vm225_vm3, %v844_v14  ;;  %3141 = vmatprep.mubr.msk.f32.mxu0 %vm3607_vm0, %v3608_v6 }
 0x8ab   :  { %3144 = vmatprep.subr.mxu0 %v3608_v6 }
 0x97c   :  { %v1143_v32 = vpop.f32.mrb[16].mxu0 }
 0x97d   :  { %v3119_v37 = vpop.f32.mrb[17].mxu0  ;;  %3137 = vmatmul.mubr.msk.f32.vlgmr.msra.gmra.mrb[16].mxu1 %vm146_vm2, %v1143_v32  ;;  %v3484_v32 = vpack.c.bf16 %v1698_v30, %v1697_v28 }
 0x97e   :  { %3455 = vmatpush3.bf16.msra.mxu1 %v3452_v40  ;;  %v1699_v37 = vld [vmem:[%s4354_s10 + $0xb0] sm:$0xff]  ;;  %v1592_v40 = vld [vmem:[%s4355_s11 + $0x20] sm:$0xff] }
 0x97f   :  { %3457 = vmatprep.subr.bf16.mxu1 %v3456_v43  ;;  %v3488_v39 = vpack.c.bf16 %v1700_v38, %v1699_v37 }
 0x982   :  { %3459 = vmatpush3.bf16.msra.mxu1 %v3456_v43 }
 0x983   :  { %3461 = vmatprep.subr.bf16.mxu1 %v3460_v56 }
 0x986   :  { %3463 = vmatpush3.bf16.msra.mxu1 %v3460_v56 }
 0x987   :  { %3465 = vmatprep.subr.bf16.mxu1 %v3464_v62 }
 0x98a   :  { %3467 = vmatpush3.bf16.msra.mxu1 %v3464_v62  ;;  %v1495_v62 = vld [vmem:[%s4355_s11] sm:$0xff] }
 0x98b   :  { %3477 = vmatprep.subr.bf16.mxu1 %v3476_v5 }
 0xa50   :  { %v1216_v44 = vpop.f32.mrb[16].mxu1 }
 0xa51   :  { %v1220_v45 = vmul.f32 0.001953125, %v1216_v44  ;;  %v3138_v46 = vpop.f32.mrb[17].mxu1 }
 0xa53   :  { %v1221_v47 = vadd.f32 1e-05, %v1220_v45 }
 0xa55   :  { %3578 = vrsqrt.f32 %v1221_v47 }
 0xa5f   :  { %v3579_v35 = vpop.eup %3578 }
 0xa60   :  { %v1223_v36 = vmul.f32 %v3579_v35, %v834_v48 }
 0xa62   :  { %3142 = vmatmul.mubr.msk.f32.vlgmr.msra.gmra.mrb[18].mxu0 %vm221_vm4, %v1223_v36 }
 0xa63   :  { %3145 = vmatpush3.msk.msra.mxu0 %vm225_vm3, %v844_v14  ;;  %3146 = vmatprep.mubr.msk.f32.mxu0 %vm3607_vm0, %v3608_v6 }
 0xa64   :  { %3437 = vmatprep.subr.bf16.mxu0 %v3436_v49 }
 0xa66   :  { %3147 = vmatmul.mubr.msk.f32.vlgmr.msra.gmra.mrb[20].mxu0 %vm221_vm4, %v835_v50  ;;  %v1594_v50 = vld [vmem:[%s4355_s11 + $0x30] sm:$0xff] }
 0xa67   :  { %3439 = vmatpush3.bf16.msra.mxu0 %v3436_v49  ;;  %v1593_v49 = vld [vmem:[%s4355_s11 + $0x28] sm:$0xff] }
 0xa68   :  { %3441 = vmatprep.subr.bf16.mxu0 %v3440_v53 }
 0xa6b   :  { %3443 = vmatpush3.bf16.msra.mxu0 %v3440_v53 }
 0xa6c   :  { %3445 = vmatprep.subr.bf16.mxu0 %v3444_v59 }
 0xa6f   :  { %3447 = vmatpush3.bf16.msra.mxu0 %v3444_v59  ;;  %v1787_v59 = vld [vmem:[%s4355_s11 + $0x48] sm:$0xff] }
 0xa70   :  { %3449 = vmatprep.subr.bf16.mxu0 %v3448_v1 }
 0xa73   :  { %3451 = vmatpush3.bf16.msra.mxu0 %v3448_v1  ;;  %v1498_v1 = vld [vmem:[%s4355_s11 + $0x18] sm:$0xff] }
 0xb35   :  { %v1293_v7 = vpop.f32.mrb[18].mxu0 }
 0xb36   :  { %v1373_v8 = vrot.slane %v1293_v7, %v3785_v29  ;;  %v3143_v9 = vpop.f32.mrb[19].mxu0  ;;  %v3515_v7 = vpack.c.bf16 %v1991_v4, %v1990_v2  ;;  %v2552_v2 = vld [vmem:[%s4360_s16 + $0x40] sm:$0xff]  ;;  %v2554_v4 = vld [vmem:[%s4360_s16 + $0x50] sm:$0xff] }
 0xb38   :  { %v1374_v10 = vmul.f32 %v1373_v8, %v3996_v21  ;;  %v1375_v12 = vmul.f32 %v1373_v8, %v3999_v22  ;;  %v1376_v14 = vmul.f32 %v1373_v8, %v4001_v23  ;;  %v1377_v15 = vmul.f32 %v1373_v8, %v4003_v24  ;;  %v1696_v21 = vld [vmem:[%s4354_s10 + $0x98] sm:$0xff] }
 0xb39   :  { %v1366_v11 = vpop.f32.mrb[20].mxu0  ;;  %v3480_v23 = vpack.c.bf16 %v1696_v21, %v1695_v25  ;;  %v1993_v8 = vld [vmem:[%s4358_s14 + $0x18] sm:$0xff] }
 0xb3a   :  { %v1381_v16 = vrot.slane %v1366_v11, %v3785_v29  ;;  %v3148_v17 = vpop.f32.mrb[21].mxu0  ;;  %v1995_v11 = vld [vmem:[%s4358_s14 + $0x28] sm:$0xff] }
 0xb3c   :  { %v1383_v18 = vadd.f32 %v1381_v16, %v1375_v12  ;;  %v1382_v19 = vadd.f32 %v1381_v16, %v1374_v10  ;;  %v1384_v20 = vadd.f32 %v1381_v16, %v1376_v14  ;;  %v1385_v26 = vadd.f32 %v1381_v16, %v1377_v15  ;;  %v1994_v10 = vld [vmem:[%s4358_s14 + $0x20] sm:$0xff]  ;;  %v1996_v14 = vld [vmem:[%s4358_s14 + $0x30] sm:$0xff]  ;;  %v1997_v15 = vld [vmem:[%s4358_s14 + $0x38] sm:$0xff] }
 0xb3d   :  { %v3521_v12 = vpack.c.bf16 %v1995_v11, %v1994_v10  ;;  %v3524_v16 = vpack.c.bf16 %v1997_v15, %v1996_v14  ;;  %v2556_v10 = vld [vmem:[%s4360_s16 + $0x60] sm:$0xff]  ;;  %v2558_v11 = vld [vmem:[%s4360_s16 + $0x70] sm:$0xff] }
 0xb3e   :  { %v1387_v22 = vmax.f32 %v1383_v18, 0.0  ;;  %v1386_v27 = vmax.f32 %v1382_v19, 0.0  ;;  %v1388_v24 = vmax.f32 %v1384_v20, 0.0  ;;  %v1389_v31 = vmax.f32 %v1385_v26, 0.0 }
 0xb40   :  { %3165 = vmatprep.mubr.msk.f32.mxu0 %vm146_vm2, %v1386_v27  ;;  %3187 = vmatprep.mubr.msk.f32.mxu1 %vm146_vm2, %v1386_v27 }
 0xb41   :  { %3166 = vmatmul.mubr.msk.f32.vlgmr.msra.gmra.mrb[22].mxu0 %vm146_vm2, %v1387_v22  ;;  %3188 = vmatmul.mubr.msk.f32.vlgmr.msra.gmra.mrb[18].mxu1 %vm146_vm2, %v1387_v22 }
 0xb42   :  { %3479 = vmatpush3.bf16.msra.mxu1 %v3476_v5  ;;  %3168 = vmatprep.mubr.msk.f32.mxu0 %vm146_vm2, %v1388_v24  ;;  %v1992_v5 = vld [vmem:[%s4358_s14 + $0x10] sm:$0xff] }
 0xb43   :  { %3190 = vmatprep.mubr.msk.f32.mxu1 %vm146_vm2, %v1388_v24  ;;  %3481 = vmatprep.subr.bf16.mxu1 %v3480_v23  ;;  %v3518_v9 = vpack.c.bf16 %v1993_v8, %v1992_v5  ;;  %v3554_v5 = vpack.c.bf16 %v2554_v4, %v2552_v2  ;;  %v2559_v8 = vld [vmem:[%s4360_s16 + $0x78] sm:$0xff] }
 0xb45   :  { %3169 = vmatmul.mubr.msk.f32.gmra.mrb[24].mxu0 %vm146_vm2, %v1389_v31  ;;  %3191 = vmatmul.mubr.msk.f32.gmra.mrb[20].mxu1 %vm146_vm2, %v1389_v31 }
 0xb46   :  { %3483 = vmatpush3.bf16.msra.mxu1 %v3480_v23  ;;  %3223 = vmatprep.mubr.msk.f32.mxu1 %vm146_vm2, %v1386_v27  ;;  %v1998_v27 = vld [vmem:[%s4359_s15] sm:$0xf] }
 0xb47   :  { %3485 = vmatprep.subr.bf16.mxu1 %v3484_v32  ;;  %3201 = vmatprep.mubr.msk.f32.mxu0 %vm72_vm1, %v1592_v40 }
 0xb4a   :  { %3487 = vmatpush3.bf16.msra.mxu1 %v3484_v32 }
 0xb4b   :  { %3489 = vmatprep.subr.bf16.mxu1 %v3488_v39 }
 0xb4e   :  { %3491 = vmatpush3.bf16.msra.mxu1 %v3488_v39 }
 0xb4f   :  { %3508 = vmatprep.subr.bf16.mxu1 %v3606_v3 }
 0xb51   :  { %3224 = vmatmul.mubr.msk.f32.vlgmr.msra.gmra.mrb[22].mxu1 %vm146_vm2, %v1387_v22 }
 0xb52   :  { %3226 = vmatprep.mubr.msk.f32.mxu1 %vm146_vm2, %v1388_v24 }
 0xb55   :  { %3227 = vmatmul.mubr.msk.f32.gmra.mrb[24].mxu1 %vm146_vm2, %v1389_v31 }
 0xb56   :  { %3265 = vmatprep.mubr.msk.f32.mxu1 %vm3607_vm0, %v3608_v6 }
 0xc14   :  { %v3167_v41 = vpop.f32.mrb[22].mxu0  ;;  %v3189_v42 = vpop.f32.mrb[18].mxu1 }
 0xc15   :  { %v1476_v43 = vpop.f32.mrb[23].mxu0  ;;  %v1573_v44 = vpop.f32.mrb[19].mxu1 }
 0xc16   :  { %v3500_v45 = vpack.c.bf16 %v3167_v41, %v1476_v43  ;;  %v3468_v46 = vpack.c.bf16 %v3189_v42, %v1573_v44 }
 0xc18   :  { %v3170_v47 = vpop.f32.mrb[24].mxu0  ;;  %v3192_v48 = vpop.f32.mrb[20].mxu1  ;;  %3469 = vmatprep.subr.bf16.mxu0 %v3468_v46 }
 0xc19   :  { %v1486_v33 = vpop.f32.mrb[25].mxu0  ;;  %v1583_v34 = vpop.f32.mrb[21].mxu1  ;;  %3471 = vmatpush3.bf16.msra.mxu0 %v3468_v46 }
 0xc1a   :  { %v3504_v35 = vpack.c.bf16 %v3170_v47, %v1486_v33  ;;  %v3472_v36 = vpack.c.bf16 %v3192_v48, %v1583_v34 }
 0xc1c   :  { %3473 = vmatprep.subr.bf16.mxu0 %v3472_v36 }
 0xc1d   :  { %3475 = vmatpush3.bf16.msra.mxu0 %v3472_v36  ;;  %v1988_v36 = vld [vmem:[%s4356_s12] sm:$0x1] }
 0xc20   :  { %3202 = vmatmul.mubr.msk.f32.vlgmr.msra.gmra.mrb[26].mxu0 %vm72_vm1, %v1593_v49  ;;  %v2545_v49 = vld [vmem:[%s4360_s16 + $0x8] sm:$0xff] }
 0xc21   :  { %3204 = vmatprep.mubr.msk.f32.mxu0 %vm72_vm1, %v1594_v50 }
 0xc24   :  { %v3225_v53 = vpop.f32.mrb[22].mxu1  ;;  %3205 = vmatmul.mubr.msk.f32.gmra.mrb[28].mxu0 %vm72_vm1, %v1595_v51 }
 0xc25   :  { %v1767_v54 = vpop.f32.mrb[23].mxu1  ;;  %3237 = vmatprep.mubr.msk.f32.mxu0 %vm72_vm1, %v1786_v52 }
 0xc26   :  { %v3492_v55 = vpack.c.bf16 %v3225_v53, %v1767_v54  ;;  %v2544_v53 = vld [vmem:[%s4360_s16] sm:$0xff]  ;;  %v2546_v54 = vld [vmem:[%s4360_s16 + $0x10] sm:$0xff] }
 0xc28   :  { %v3228_v56 = vpop.f32.mrb[24].mxu1  ;;  %3493 = vmatprep.subr.bf16.mxu0 %v3492_v55 }
 0xc29   :  { %v1777_v57 = vpop.f32.mrb[25].mxu1  ;;  %3495 = vmatpush3.bf16.msra.mxu0 %v3492_v55  ;;  %v2549_v55 = vld [vmem:[%s4360_s16 + $0x28] sm:$0xff] }
 0xc2a   :  { %v3496_v58 = vpack.c.bf16 %v3228_v56, %v1777_v57  ;;  %v2551_v56 = vld [vmem:[%s4360_s16 + $0x38] sm:$0xff]  ;;  %v1989_v57 = vld [vmem:[%s4357_s13] sm:$0x1] }
 0xc2c   :  { %3497 = vmatprep.subr.bf16.mxu0 %v3496_v58 }
 0xc2d   :  { %3499 = vmatpush3.bf16.msra.mxu0 %v3496_v58  ;;  %v3546_v58 = vpack.c.bf16 %v2546_v54, %v2544_v53 }
 0xc2e   :  { %3501 = vmatprep.subr.bf16.mxu0 %v3500_v45 }
 0xc30   :  { %3238 = vmatmul.mubr.msk.f32.vlgmr.msra.gmra.mrb[26].mxu0 %vm72_vm1, %v1787_v59  ;;  %v3548_v59 = vpack.c.bf16 %v2551_v56, %v2549_v55 }
 0xc31   :  { %3503 = vmatpush3.bf16.msra.mxu0 %v3500_v45  ;;  %3240 = vmatprep.mubr.msk.f32.mxu0 %vm72_vm1, %v1788_v60  ;;  %v2548_v60 = vld [vmem:[%s4360_s16 + $0x20] sm:$0xff] }
 0xc32   :  { %3505 = vmatprep.subr.bf16.mxu0 %v3504_v35 }
 0xc34   :  { %3241 = vmatmul.mubr.msk.f32.gmra.mrb[28].mxu0 %vm72_vm1, %v1789_v61  ;;  %v2550_v61 = vld [vmem:[%s4360_s16 + $0x30] sm:$0xff] }
 0xc35   :  { %3507 = vmatpush3.bf16.msra.mxu0 %v3504_v35  ;;  %3251 = vmatprep.mubr.msk.f32.mxu0 %vm72_vm1, %v1495_v62  ;;  %v3550_v62 = vpack.c.bf16 %v2550_v61, %v2548_v60 }
 0xc36   :  { %3514 = vmatprep.subr.bf16.mxu0 %v3606_v3 }
 0xc38   :  { %3252 = vmatmul.mubr.msk.f32.vlgmr.msra.gmra.mrb[26].mxu0 %vm72_vm1, %v1496_v63  ;;  %v2553_v63 = vld [vmem:[%s4360_s16 + $0x48] sm:$0xff] }
 0xc39   :  { %3254 = vmatprep.mubr.msk.f32.mxu0 %vm72_vm1, %v1497_v0  ;;  %3516 = vmatpush3.bf16.msra.mxu0 %v3515_v7  ;;  %v2555_v0 = vld [vmem:[%s4360_s16 + $0x58] sm:$0xff] }
 0xc3a   :  { %3517 = vmatprep.subr.bf16.mxu0 %v3606_v3 }
 0xc3c   :  { %3255 = vmatmul.mubr.msk.f32.gmra.mrb[28].mxu0 %vm72_vm1, %v1498_v1  ;;  %v3552_v1 = vpack.c.bf16 %v2555_v0, %v2553_v63 }
 0xc3d   :  { %3284 = vmatprep.mubr.msk.f32.mxu0 %vm3607_vm0, %v3608_v6  ;;  %3519 = vmatpush3.bf16.msra.mxu0 %v3518_v9 }
 0xc3e   :  { %3520 = vmatprep.subr.bf16.mxu0 %v3606_v3 }
 0xc41   :  { %3522 = vmatpush3.bf16.msra.mxu0 %v3521_v12 }
 0xc42   :  { %3523 = vmatprep.subr.bf16.mxu0 %v3606_v3 }
 0xc45   :  { %3525 = vmatpush3.bf16.msra.mxu0 %v3524_v16 }
 0xc46   :  { %3322 = vmatprep.subr.mxu0 %v3608_v6 }
 0xd0b   :  { %v3253_v17 = vpop.f32.mrb[26].mxu0 }
 0xd0c   :  { %v1965_v18 = vpop.f32.mrb[27].mxu0 }
 0xd0d   :  { %v3509_v19 = vpack.c.bf16 %v3253_v17, %v1965_v18 }
 0xd0f   :  { %v3256_v20 = vpop.f32.mrb[28].mxu0  ;;  %3510 = vmatpush3.bf16.msra.mxu1 %v3509_v19 }
 0xd10   :  { %v1975_v25 = vpop.f32.mrb[29].mxu0  ;;  %3511 = vmatprep.subr.bf16.mxu1 %v3606_v3 }
 0xd11   :  { %v3512_v21 = vpack.c.bf16 %v3256_v20, %v1975_v25 }
 0xd13   :  { %3513 = vmatpush3.bf16.msra.mxu1 %v3512_v21 }
 0xd14   :  { %3287 = vmatprep.subr.mxu1 %v3608_v6 }
 0xd16   :  { %3266 = vmatmul.mubr.msk.f32.vlgmr.msra.gmra.mrb[26].mxu1 %vm72_vm1, %v3609_v13 }
 0xd17   :  { %3289 = vmatprep.mubr.msk.f32.mxu1 %vm3607_vm0, %v3608_v6  ;;  %3288 = vmatpush3.msk.msra.mxu1 %vm225_vm3, %v1998_v27 }
 0xd18   :  { %3526 = vmatprep.subr.bf16.mxu1 %v3606_v3 }
 0xde9   :  { %v2065_v26 = vpop.f32.mrb[26].mxu1 }
 0xdea   :  { %v3267_v22 = vpop.f32.mrb[27].mxu1  ;;  %3285 = vmatmul.mubr.msk.f32.vlgmr.msra.gmra.mrb[30].mxu0 %vm146_vm2, %v2065_v26 }
 0xdeb   :  { %3324 = vmatprep.mubr.msk.f32.mxu0 %vm3607_vm0, %v3608_v6  ;;  %3323 = vmatpush3.msk.msra.mxu0 %vm225_vm3, %v1998_v27 }
 0xdec   :  { %3327 = vmatprep.subr.mxu0 %v3608_v6 }
 0xebd   :  { %v2138_v23 = vpop.f32.mrb[30].mxu0 }
 0xebe   :  { %v2142_v24 = vmul.f32 0.001953125, %v2138_v23  ;;  %v3286_v28 = vpop.f32.mrb[31].mxu0 }
 0xec0   :  { %3290 = vmatmul.mubr.msk.f32.vlgmr.msra.gmra.mrb[28].mxu1 %vm221_vm4, %v2142_v24 }
 0xec1   :  { %3300 = vmatprep.mubr.msk.f32.mxu1 %vm3607_vm0, %v3608_v6 }
 0xf93   :  { %v2215_v30 = vpop.f32.mrb[28].mxu1 }
 0xf94   :  { %v2222_v31 = vrot.slane %v2215_v30, %v3785_v29  ;;  %v3291_v32 = vpop.f32.mrb[29].mxu1 }
 0xf95   :  { %v2573_v32 = vpop.permute.xlu0 %2572 }
 0xf96   :  { %v4225_v37 = vsub.f32 %v1965_v18, %v2222_v31  ;;  %v4227_v38 = vsub.f32 %v3253_v17, %v2222_v31  ;;  %v4229_v39 = vsub.f32 %v1975_v25, %v2222_v31  ;;  %v4231_v40 = vsub.f32 %v3256_v20, %v2222_v31 }
 0xf98   :  { %v2227_v41 = vmul.f32 %v4225_v37, %v4225_v37  ;;  %v2228_v42 = vmul.f32 %v4227_v38, %v4227_v38  ;;  %v2229_v44 = vmul.f32 %v4229_v39, %v4229_v39  ;;  %v2230_v45 = vmul.f32 %v4231_v40, %v4231_v40 }
 0xf9a   :  { %v3527_v43 = vpack.c.bf16 %v2228_v42, %v2227_v41  ;;  %v3530_v46 = vpack.c.bf16 %v2230_v45, %v2229_v44 }
 0xf9c   :  { %3528 = vmatpush3.bf16.msra.mxu1 %v3527_v43 }
 0xf9d   :  { %3529 = vmatprep.subr.bf16.mxu1 %v3606_v3 }
 0xfa0   :  { %3531 = vmatpush3.bf16.msra.mxu1 %v3530_v46 }
 0xfa1   :  { %3532 = vmatprep.subr.bf16.mxu1 %v3606_v3 }
 0xfa3   :  { %3301 = vmatmul.mubr.msk.f32.vlgmr.msra.gmra.mrb[30].mxu1 %vm72_vm1, %v3609_v13 }
 0xfa4   :  { %3534 = vmatpush3.bf16.msra.mxu1 %v3515_v7  ;;  %3319 = vmatprep.mubr.msk.f32.mxu1 %vm3607_vm0, %v3608_v6  ;;  %v2557_v7 = vld [vmem:[%s4360_s16 + $0x68] sm:$0xff] }
 0xfa5   :  { %3535 = vmatprep.subr.bf16.mxu1 %v3606_v3 }
 0xfa8   :  { %3537 = vmatpush3.bf16.msra.mxu1 %v3518_v9  ;;  %v3556_v9 = vpack.c.bf16 %v2559_v8, %v2557_v7 }
 0xfa9   :  { %3538 = vmatprep.subr.bf16.mxu1 %v3606_v3 }
 0xfac   :  { %3540 = vmatpush3.bf16.msra.mxu1 %v3521_v12  ;;  %v3558_v12 = vpack.c.bf16 %v2558_v11, %v2556_v10 }
 0xfad   :  { %3541 = vmatprep.subr.bf16.mxu1 %v3606_v3  ;;  %v2547_v3 = vld [vmem:[%s4360_s16 + $0x18] sm:$0xff]  ;;  %s3611_s16 = smov [#allocation2]  }
 0xfae   :  { %v3544_v52 = vpack.c.bf16 %v2547_v3, %v2545_v49  ;;  %s2726_s4 = sshll.u32 %s3611_s16, 4  ;;  %s2727_s4 = int_to_ptr.vmem [resolvable:$true] %s2726_s4 }
 0xfaf   :  { %s3582_s21 = scalar_lea.vmem %s2727_s4, 1024  ;;  %p3587_p1 = scmp.lt.s32.totalorder %s2727_s4, %s2727_s4 }
 0xfb0   :  { %3543 = vmatpush3.bf16.msra.mxu1 %v3524_v16  ;;  %p3583_p0 = scmp.ne.s32.totalorder %s2727_s4, %s3582_s21  ;;  %p3588_p2 = scmp.lt.s32.totalorder %s3582_s21, %s3582_s21 }
 0xfb2   :  { %p3589_p3 = por %p3588_p2, %p3587_p1 }
 0xfb4   :  { %p3590_p4 = pnand %p3589_p3, %p3583_p0 }
0x1076   :  { %v2297_v47 = vpop.f32.mrb[30].mxu1 }
0x1077   :  { %v3302_v48 = vpop.f32.mrb[31].mxu1  ;;  %3320 = vmatmul.mubr.msk.f32.vlgmr.msra.gmra.mrb[32].mxu1 %vm146_vm2, %v2297_v47 }
0x114a   :  { %v2370_v33 = vpop.f32.mrb[32].mxu1 }
0x114b   :  { %v2374_v34 = vmul.f32 0.001953125, %v2370_v33  ;;  %v3321_v13 = vpop.f32.mrb[33].mxu1 }
0x114d   :  { %v2375_v35 = vadd.f32 1e-05, %v2374_v34 }
0x114f   :  { %3580 = vrsqrt.f32 %v2375_v35 }
0x1159   :  { %v3581_v50 = vpop.eup %3580 }
0x115a   :  { %v2377_v51 = vmul.f32 %v3581_v50, %v1988_v36 }
0x115c   :  { %3325 = vmatmul.mubr.msk.f32.vlgmr.msra.gmra.mrb[32].mxu0 %vm221_vm4, %v2377_v51 }
0x115d   :  { %3328 = vmatpush3.msk.msra.mxu0 %vm225_vm3, %v1998_v27  ;;  %3329 = vmatprep.mubr.msk.f32.mxu0 %vm3607_vm0, %v3608_v6 }
0x115e   :  { %3545 = vmatprep.subr.bf16.mxu0 %v3544_v52 }
0x1160   :  { %3330 = vmatmul.mubr.msk.f32.vlgmr.msra.gmra.mrb[34].mxu0 %vm221_vm4, %v1989_v57 }
0x1161   :  { %3547 = vmatpush1.bf16.msra.mxu0 %v3546_v58  ;;  %2688 = vmatprep.mubr.f32.mxu0 %v3608_v6 }
0x1162   :  { %3549 = vmatprep.subr.bf16.mxu0 %v3548_v59 }
0x1165   :  { %3551 = vmatpush1.bf16.msra.mxu0 %v3550_v62 }
0x1166   :  { %3553 = vmatprep.subr.bf16.mxu0 %v3552_v1 }
0x1169   :  { %3555 = vmatpush1.bf16.msra.mxu0 %v3554_v5 }
0x116a   :  { %3557 = vmatprep.subr.bf16.mxu0 %v3556_v9 }
0x116d   :  { %3559 = vmatpush1.bf16.msra.mxu0 %v3558_v12 }
0x122f   :  { %v2447_v14 = vpop.f32.mrb[32].mxu0 }
0x1230   :  { %v2527_v15 = vrot.slane %v2447_v14, %v3785_v29  ;;  %v3326_v16 = vpop.f32.mrb[33].mxu0 }
0x1232   :  { %v2528_v17 = vmul.f32 %v2527_v15, %v4225_v37  ;;  %v2529_v19 = vmul.f32 %v2527_v15, %v4227_v38  ;;  %v2530_v20 = vmul.f32 %v2527_v15, %v4229_v39  ;;  %v2531_v25 = vmul.f32 %v2527_v15, %v4231_v40  ;;  %v2583_v37 = vpop.permute.xlu1 %2582  ;;  %v2575_v38 = vpop.permute.xlu0 %2574 }
0x1233   :  { %v2520_v18 = vpop.f32.mrb[34].mxu0  ;;  %v2596_v44 = vsel %vm146_vm2, %v2573_v32, %v2575_v38 }
0x1234   :  { %v2535_v21 = vrot.slane %v2520_v18, %v3785_v29  ;;  %v3331_v26 = vpop.f32.mrb[35].mxu0 }
0x1236   :  { %v2536_v22 = vadd.f32 %v2535_v21, %v2528_v17  ;;  %v2537_v27 = vadd.f32 %v2535_v21, %v2529_v19  ;;  %v2538_v23 = vadd.f32 %v2535_v21, %v2530_v20  ;;  %v2539_v24 = vadd.f32 %v2535_v21, %v2531_v25  ;;  %v2577_v39 = vpop.permute.xlu1 %2576  ;;  %v2581_v40 = vpop.permute.xlu0 %2580 }
0x1237   :  { %v2597_v47 = vsel %vm146_vm2, %v2575_v38, %v2577_v39  ;;  %v2599_v49 = vsel %vm146_vm2, %v2581_v40, %v2583_v37 }
0x1238   :  { %v2540_v28 = vmax.f32 %v2536_v22, 0.0  ;;  %v2541_v30 = vmax.f32 %v2537_v27, 0.0  ;;  %v2542_v31 = vmax.f32 %v2538_v23, 0.0  ;;  %v2543_v29 = vmax.f32 %v2539_v24, 0.0 }
0x123a   :  { %2799 = vmatmul.mubr.msk.f32.vlgmr.msra.gmra.mrb[36].mxu0 %vm146_vm2, %v2540_v28  ;;  %v2579_v41 = vpop.permute.xlu1 %2578  ;;  %v2589_v42 = vpop.permute.xlu0 %2588 }
0x123b   :  { %2694 = vmatprep.mubr.f32.mxu0 %v3608_v6  ;;  %v2598_v13 = vsel %vm146_vm2, %v2579_v41, %v2581_v40 }
0x123e   :  { %2800 = vmatmul.mubr.msk.f32.gmra.mrb[38].mxu0 %vm146_vm2, %v2541_v30  ;;  %v2587_v43 = vpop.permute.xlu1 %2586 }
0x123f   :  { %2700 = vmatprep.mubr.f32.mxu0 %v3608_v6  ;;  %v2601_v55 = vsel %vm146_vm2, %v2587_v43, %v2589_v42 }
0x1242   :  { %2801 = vmatmul.mubr.msk.f32.gmra.mrb[40].mxu0 %vm146_vm2, %v2542_v31  ;;  %v2591_v34 = vpop.permute.xlu1 %2590 }
0x1243   :  { %2706 = vmatprep.mubr.f32.mxu0 %v3608_v6  ;;  %v2585_v6 = vpop.permute.xlu0 %2584 }
0x1244   :  { %v2600_v51 = vsel %vm146_vm2, %v2585_v6, %v2587_v43 }
0x1246   :  { %2802 = vmatmul.mubr.msk.f32.gmra.mrb[42].mxu0 %vm146_vm2, %v2543_v29  ;;  %v2595_v57 = vpop.permute.xlu1 %2594 }
0x1247   :  { %v2593_v53 = vpop.permute.xlu0 %2592 }
0x1248   :  { %v2602_v59 = vsel %vm146_vm2, %v2591_v34, %v2593_v53  ;;  %v2603_v62 = vsel %vm146_vm2, %v2593_v53, %v2595_v57 }
0x130d   :  { %v2690_v45 = vpop.f32.mrb[36].mxu0 }
0x130e   :  { %v2691_v46 = vadd.f32 %v2690_v45, %v2596_v44  ;;  %v2692_v48 = vpop.f32.mrb[37].mxu0 }
0x130f   :  { %v2693_v33 = vadd.f32 %v2692_v48, %v2597_v47 }
0x1310   :  { %2713 = vst [vmem:[#allocation2] sm:$0xff] %v2691_v46 }
0x1311   :  { %2714 = vst [vmem:[#allocation2 + $0x8] sm:$0xff] %v2693_v33  ;;  %v2696_v35 = vpop.f32.mrb[38].mxu0 }
0x1312   :  { %v2697_v36 = vadd.f32 %v2696_v35, %v2598_v13  ;;  %v2698_v3 = vpop.f32.mrb[39].mxu0 }
0x1313   :  { %v2699_v50 = vadd.f32 %v2698_v3, %v2599_v49 }
0x1314   :  { %2715 = vst [vmem:[#allocation2 + $0x10] sm:$0xff] %v2697_v36 }
0x1315   :  { %2716 = vst [vmem:[#allocation2 + $0x18] sm:$0xff] %v2699_v50  ;;  %v2702_v52 = vpop.f32.mrb[40].mxu0 }
0x1316   :  { %v2703_v54 = vadd.f32 %v2702_v52, %v2600_v51  ;;  %v2704_v56 = vpop.f32.mrb[41].mxu0 }
0x1317   :  { %v2705_v58 = vadd.f32 %v2704_v56, %v2601_v55 }
0x1318   :  { %2717 = vst [vmem:[#allocation2 + $0x20] sm:$0xff] %v2703_v54 }
0x1319   :  { %2718 = vst [vmem:[#allocation2 + $0x28] sm:$0xff] %v2705_v58  ;;  %v2708_v60 = vpop.f32.mrb[42].mxu0 }
0x131a   :  { %v2709_v61 = vadd.f32 %v2708_v60, %v2602_v59  ;;  %v2710_v63 = vpop.f32.mrb[43].mxu0 }
0x131b   :  { %v2711_v0 = vadd.f32 %v2710_v63, %v2603_v62 }
0x131c   :  { %2719 = vst [vmem:[#allocation2 + $0x30] sm:$0xff] %v2709_v61 }
0x131d   :  { %2720 = vst [vmem:[#allocation2 + $0x38] sm:$0xff] %v2711_v0 }
0x131e   :  { %3593 = shalt.err (!%p3590_p4)
}
0x131f   :  { %s3594_s22 = scalar_lea.hbm %s4361_s17, 1024 }
0x1320   :  { %p3595_p5 = scmp.ne.s32.totalorder %s4361_s17, %s3594_s22  ;;  %p3598_p6 = scmp.lt.u32.totalorder %s3594_s22, %s4361_s17 }
0x1322   :  { %p3600_p7 = pnand %p3598_p6, %p3595_p5 }
0x1324   :  { %3603 = shalt.err (!%p3600_p7)
}
0x1325   :  { %s3612_s27 = smov 256   ;;  %s3613_s11 = smov 16  }
0x1326   :  { %2732 = dma.vmem_to_hbm [thread:$0]  %s2727_s4, 1024, %s4361_s17, [#allocation3], %s3612_s27, %s3612_s27, %s3613_s11  }
0x1327   :  { %3604 = dma.done.wait [#allocation3], 1024  }
0x1328   :  { %3605 = vsyncadd [#allocation3], 4294966272 }
0x1329   :  { %2736 = vsyncpa [#allocation3], 1 }

</bundles_post_ra>
